<compile_context>
chip_gen: v7x
topology: tpu7x:2x2x1
jax: 0.10.0
libtpu: 0.0.40
codegen_flags: <defaults>
</compile_context>

<pallas_src>
import math
import jax
import jax.numpy as jnp
from jax.experimental import pallas as pl
from jax.experimental.pallas import tpu as pltpu

# ---------------- configuration (small, lane-friendly) ----------------
VOCAB = 64
B = 2              # batch
S = 8              # sequence length
H = 128            # hidden size (lane-aligned)
NUM_HEADS = 2
HEAD_DIM = H // NUM_HEADS
FF = 512           # FFN intermediate size
NUM_LAYERS = 2
LN_EPS = 1e-12
BF16 = jnp.bfloat16


# ---------------- in-kernel helpers ----------------
def _layernorm(x, gamma, beta):
    # fused statistics: one pass for E[x] and E[x^2], var = E[x^2] - mu^2
    mu = jnp.mean(x, axis=-1, keepdims=True)
    ex2 = jnp.mean(x * x, axis=-1, keepdims=True)
    var = ex2 - mu * mu
    return (x - mu) * jax.lax.rsqrt(var + LN_EPS) * gamma + beta


# ---------------- Pallas kernel: one grid step == one encoder layer ----------------
def fused_bert_kernel(emb_ref, neg_ref,
                      emb_g_ref, emb_b_ref,
                      wqkv_ref, bqkv_ref, wo_ref, bo_ref,
                      g1_ref, b1_ref,
                      w1_ref, bff1_ref, w2_ref, bff2_ref,
                      g2_ref, b2_ref,
                      wp_ref, bp_ref,
                      hid_ref, cls_ref,
                      x_scratch):
    l = pl.program_id(0)

    # layer 0: embedding LayerNorm seeds the persistent residual-stream scratch
    @pl.when(l == 0)
    def _():
        x_scratch[...] = _layernorm(emb_ref[...], emb_g_ref[...], emb_b_ref[...])

    x = x_scratch[...]                                    # (B*S, H) f32
    neg = neg_ref[...]                                    # (B, S, S) additive key mask

    # ---- self-attention ----
    # fused QKV projection; 1/sqrt(Dh) already folded into the Q columns of wqkv
    qkv = jnp.dot(x.astype(BF16), wqkv_ref[...],
                  preferred_element_type=jnp.float32) + bqkv_ref[...]   # (B*S, 3H) f32
    qkv3 = qkv.reshape(B, S, 3 * H).astype(BF16)

    # TODO(synk): per-head unroll kept (NUM_HEADS=2): a single 'bqhd,bkhd->bhqk'
    # einsum needs a dot_general with two batch dims, which Mosaic does not reliably
    # lower; the single-batch-dim einsums below are the proven-supported form.
    ctx_heads = []
    for h in range(NUM_HEADS):
        q_h = qkv3[:, :, h * HEAD_DIM:(h + 1) * HEAD_DIM]                      # (B,S,Dh)
        k_h = qkv3[:, :, H + h * HEAD_DIM:H + (h + 1) * HEAD_DIM]
        v_h = qkv3[:, :, 2 * H + h * HEAD_DIM:2 * H + (h + 1) * HEAD_DIM]
        # batched q.k^T (no explicit transpose; MXU consumes it natively)
        s = jnp.einsum('bqd,bkd->bqk', q_h, k_h,
                       preferred_element_type=jnp.float32) + neg               # (B,S,S)
        m = jnp.max(s, axis=-1, keepdims=True)
        p = jnp.exp(s - m)
        # approx reciprocal uses the EUP slot; use approx=False for bit-exact softmax
        p = p * pl.reciprocal(jnp.sum(p, axis=-1, keepdims=True), approx=True)
        ctx_heads.append(jnp.einsum('bqk,bkd->bqd', p.astype(BF16), v_h,
                                    preferred_element_type=jnp.float32))       # (B,S,Dh)
    # heads concatenated on lanes 0:64 / 64:128 -> ONE full-K(128) matmul against Wo
    ctx = jnp.concatenate(ctx_heads, axis=-1).reshape(B * S, H)
    attn = jnp.dot(ctx.astype(BF16), wo_ref[...],
                   preferred_element_type=jnp.float32) + bo_ref[...]           # (B*S, H)

    # ---- FFN ----
    x1 = _layernorm(x + attn, g1_ref[...], b1_ref[...])
    # TODO(synk): FFN activations kept f32 (v5e has no bf16 VALU/EUP); on v6e/v7x this
    # (B*S, FF) intermediate could be held in bf16 to halve vreg/load-store traffic.
    h1 = jnp.dot(x1.astype(BF16), w1_ref[...],
                 preferred_element_type=jnp.float32) + bff1_ref[...]
    # TODO(synk): HF BERT uses exact erf GELU; tanh approximation kept (EUP-friendly).
    h1 = jax.nn.gelu(h1, approximate=True)
    ffn = jnp.dot(h1.astype(BF16), w2_ref[...],
                  preferred_element_type=jnp.float32) + bff2_ref[...]
    x_new = _layernorm(x1 + ffn, g2_ref[...], b2_ref[...])
    x_scratch[...] = x_new

    # ---- epilogue on the last layer: hidden states + BERT pooler ----
    @pl.when(l == pl.num_programs(0) - 1)
    def _():
        hid_ref[...] = x_new                                      # (B*S, H) lane-dense
        cls = x_new.reshape(B, S, H)[:, 0, :]                     # token 0 of each sequence
        cls_ref[...] = jnp.tanh(
            jnp.dot(cls.astype(BF16), wp_ref[...],
                    preferred_element_type=jnp.float32) + bp_ref[...])


# ---------------- pallas_call wrapper ----------------
def fused_bert_call(emb_flat, neg_mask, p):
    # whole-array blocks with a constant index map (DMA'd once, stay resident)
    def full_spec(shape):
        return pl.BlockSpec(shape, lambda l, _n=len(shape): (0,) * _n)

    # per-layer block of a stacked (L, ...) weight; leading dim squeezed in-kernel
    def layer_spec(tail):
        return pl.BlockSpec((None,) + tail, lambda l, _n=len(tail): (l,) + (0,) * _n)

    args = (emb_flat, neg_mask,
            p["emb_gamma"], p["emb_beta"],
            p["wqkv"], p["bqkv"], p["wo"], p["bo"],
            p["g1"], p["b1"],
            p["w1"], p["bff1"], p["w2"], p["bff2"],
            p["g2"], p["b2"],
            p["pooler_w"], p["pooler_b"])

    in_specs = [
        full_spec((B * S, H)),            # embeddings (post token/pos/type sum)
        full_spec((B, S, S)),             # additive key mask (pre-broadcast)
        full_spec((1, H)), full_spec((1, H)),            # embedding LN
        layer_spec((H, 3 * H)), layer_spec((1, 3 * H)),  # QKV
        layer_spec((H, H)), layer_spec((1, H)),          # attn out
        layer_spec((1, H)), layer_spec((1, H)),          # LN1
        layer_spec((H, FF)), layer_spec((1, FF)),        # FFN in
        layer_spec((FF, H)), layer_spec((1, H)),         # FFN out
        layer_spec((1, H)), layer_spec((1, H)),          # LN2
        full_spec((H, H)), full_spec((1, H)),            # pooler
    ]
    out_specs = (full_spec((B * S, H)), full_spec((B, H)))

    grid_spec = pltpu.PrefetchScalarGridSpec(
        num_scalar_prefetch=0,
        grid=(NUM_LAYERS,),               # layer axis: streamed, double-buffered weights
        in_specs=in_specs,
        out_specs=out_specs,
        scratch_shapes=[pltpu.VMEM((B * S, H), jnp.float32)])   # persistent residual stream

    # TODO(synk): at realistic B/S/H add a leading "parallel" batch grid axis so v7x's
    # second TensorCore is used; at B=2/S=8 the ~0.35us per-grid-step overhead dominates.
    return pl.pallas_call(
        fused_bert_kernel,
        out_shape=(jax.ShapeDtypeStruct((B * S, H), jnp.float32),
                   jax.ShapeDtypeStruct((B, H), jnp.float32)),
        grid_spec=grid_spec,
        compiler_params=pltpu.CompilerParams(
            dimension_semantics=("arbitrary",),        # carried residual stream -> sequential
            vmem_limit_bytes=32 * 1024 * 1024),        # conservative: fits v7x's 64 MiB VMEM
    )(*args)


# ---------------- parameter init (deterministic, synthetic; matmul weights in bf16) ----------------
def init_params(key):
    def nrm(k, shape):
        return jax.random.normal(k, shape, jnp.float32) * 0.02

    keys = jax.random.split(key, 4 + NUM_LAYERS)
    params = {
        "word_emb": nrm(keys[0], (VOCAB, H)),
        "pos_emb": nrm(keys[1], (S, H)),
        "type_emb": nrm(keys[2], (2, H)),
        "emb_gamma": jnp.ones((1, H), jnp.float32),
        "emb_beta": jnp.zeros((1, H), jnp.float32),
        "pooler_w": nrm(keys[3], (H, H)).astype(BF16),
        "pooler_b": jnp.zeros((1, H), jnp.float32),
    }
    wqkv, wo, w1, w2 = [], [], [], []
    for l in range(NUM_LAYERS):
        lk = jax.random.split(keys[4 + l], 4)
        wqkv.append(nrm(lk[0], (H, 3 * H)))
        wo.append(nrm(lk[1], (H, H)))
        w1.append(nrm(lk[2], (H, FF)))
        w2.append(nrm(lk[3], (FF, H)))

    # fold the attention scale 1/sqrt(head_dim) into the Q columns of wqkv (and bqkv)
    qkv_scale = jnp.concatenate(
        [jnp.full((H,), 1.0 / math.sqrt(HEAD_DIM), jnp.float32),
         jnp.ones((2 * H,), jnp.float32)])
    params["wqkv"] = (jnp.stack(wqkv) * qkv_scale).astype(BF16)      # (L, H, 3H)
    params["wo"] = jnp.stack(wo).astype(BF16)                        # (L, H, H)
    params["w1"] = jnp.stack(w1).astype(BF16)                        # (L, H, FF)
    params["w2"] = jnp.stack(w2).astype(BF16)                        # (L, FF, H)
    params["bqkv"] = jnp.zeros((NUM_LAYERS, 1, 3 * H), jnp.float32) * qkv_scale
    params["bo"] = jnp.zeros((NUM_LAYERS, 1, H), jnp.float32)
    params["g1"] = jnp.ones((NUM_LAYERS, 1, H), jnp.float32)
    params["b1"] = jnp.zeros((NUM_LAYERS, 1, H), jnp.float32)
    params["bff1"] = jnp.zeros((NUM_LAYERS, 1, FF), jnp.float32)
    params["bff2"] = jnp.zeros((NUM_LAYERS, 1, H), jnp.float32)
    params["g2"] = jnp.ones((NUM_LAYERS, 1, H), jnp.float32)
    params["b2"] = jnp.zeros((NUM_LAYERS, 1, H), jnp.float32)
    return params


# ---------------- forward (mirrors Transformers.forward) ----------------
def transformers_forward(params, tokens, attention_mask, selects):
    b, s = tokens.shape
    # embeddings (gathers = plain-JAX glue), token_type_ids = zeros_like(tokens)
    emb = (params["word_emb"][tokens]
           + params["pos_emb"][None, :s, :]
           + params["type_emb"][0][None, None, :])                    # (B, S, H) f32
    # additive key mask: computed AND broadcast once here (not per layer/head in-kernel)
    neg = (1.0 - attention_mask.astype(jnp.float32)) * -1e9           # (B, S)
    neg_mask = jnp.broadcast_to(neg[:, None, :], (b, s, s))           # (B, S, S)

    hid_flat, cls_hidden = fused_bert_call(emb.reshape(b * s, H), neg_mask, params)

    # hiddens = transformer_hiddens.view(-1, H).index_select(0, selects)
    # TODO(synk): index_select kept as plain-JAX gather (pure data-movement glue).
    hiddens = jnp.take(hid_flat, selects, axis=0)
    return hiddens, cls_hidden


# ---------------- main ----------------
if __name__ == "__main__":
    key = jax.random.PRNGKey(0)
    pkey, tkey = jax.random.split(key)
    params = init_params(pkey)

    tokens = jax.random.randint(tkey, (B, S), 0, VOCAB, dtype=jnp.int32)
    seq_lens = [S, S - 2]                                   # second sequence is padded
    attention_mask = jnp.array(
        [[1 if j < seq_lens[i] else 0 for j in range(S)] for i in range(B)],
        dtype=jnp.int32)
    # selects: flat indices of the non-padded tokens (what AGIF feeds in)
    selects = jnp.array(
        [i * S + j for i in range(B) for j in range(seq_lens[i])], dtype=jnp.int32)

    fwd = jax.jit(transformers_forward)
    hiddens, cls_hidden = fwd(params, tokens, attention_mask, selects)
    jax.block_until_ready((hiddens, cls_hidden))

    assert hiddens.shape == (sum(seq_lens), H)
    assert cls_hidden.shape == (B, H)
    assert bool(jnp.all(jnp.isfinite(hiddens))) and bool(jnp.all(jnp.isfinite(cls_hidden)))
    print("KERNEL_OK")
</pallas_src>

<mosaic_0001>
module attributes {stable_mosaic.version = 11 : i64} {
  func.func @fused_bert_kernel(%arg0: i32, %arg1: memref<16x128xf32, #tpu.memory_space<vmem>>, %arg2: memref<2x8x8xf32, #tpu.memory_space<vmem>>, %arg3: memref<1x128xf32, #tpu.memory_space<vmem>>, %arg4: memref<1x128xf32, #tpu.memory_space<vmem>>, %arg5: memref<1x128x384xbf16, #tpu.memory_space<vmem>>, %arg6: memref<1x1x384xf32, #tpu.memory_space<vmem>>, %arg7: memref<1x128x128xbf16, #tpu.memory_space<vmem>>, %arg8: memref<1x1x128xf32, #tpu.memory_space<vmem>>, %arg9: memref<1x1x128xf32, #tpu.memory_space<vmem>>, %arg10: memref<1x1x128xf32, #tpu.memory_space<vmem>>, %arg11: memref<1x128x512xbf16, #tpu.memory_space<vmem>>, %arg12: memref<1x1x512xf32, #tpu.memory_space<vmem>>, %arg13: memref<1x512x128xbf16, #tpu.memory_space<vmem>>, %arg14: memref<1x1x128xf32, #tpu.memory_space<vmem>>, %arg15: memref<1x1x128xf32, #tpu.memory_space<vmem>>, %arg16: memref<1x1x128xf32, #tpu.memory_space<vmem>>, %arg17: memref<128x128xbf16, #tpu.memory_space<vmem>>, %arg18: memref<1x128xf32, #tpu.memory_space<vmem>>, %arg19: memref<16x128xf32, #tpu.memory_space<vmem>>, %arg20: memref<2x128xf32, #tpu.memory_space<vmem>>, %arg21: memref<16x128xf32, #tpu.memory_space<vmem>>) attributes {dimension_semantics = [#tpu.dimension_semantics<arbitrary>], iteration_bounds = array<i64: 2>, scalar_prefetch = 0 : i64, scratch_operands = 1 : i64, tpu.core_type = #tpu.core_type<tc>, window_params = [{pipeline_mode = #tpu.pipeline_mode<synchronous>, transform_indices = @transform_0, window_bounds = array<i64: 16, 128>}, {pipeline_mode = #tpu.pipeline_mode<synchronous>, transform_indices = @transform_1, window_bounds = array<i64: 2, 8, 8>}, {pipeline_mode = #tpu.pipeline_mode<synchronous>, transform_indices = @transform_2, window_bounds = array<i64: 1, 128>}, {pipeline_mode = #tpu.pipeline_mode<synchronous>, transform_indices = @transform_3, window_bounds = array<i64: 1, 128>}, {transform_indices = @transform_4, window_bounds = array<i64: 1, 128, 384>}, {transform_indices = @transform_5, window_bounds = array<i64: 1, 1, 384>}, {transform_indices = @transform_6, window_bounds = array<i64: 1, 128, 128>}, {transform_indices = @transform_7, window_bounds = array<i64: 1, 1, 128>}, {transform_indices = @transform_8, window_bounds = array<i64: 1, 1, 128>}, {transform_indices = @transform_9, window_bounds = array<i64: 1, 1, 128>}, {transform_indices = @transform_10, window_bounds = array<i64: 1, 128, 512>}, {transform_indices = @transform_11, window_bounds = array<i64: 1, 1, 512>}, {transform_indices = @transform_12, window_bounds = array<i64: 1, 512, 128>}, {transform_indices = @transform_13, window_bounds = array<i64: 1, 1, 128>}, {transform_indices = @transform_14, window_bounds = array<i64: 1, 1, 128>}, {transform_indices = @transform_15, window_bounds = array<i64: 1, 1, 128>}, {pipeline_mode = #tpu.pipeline_mode<synchronous>, transform_indices = @transform_16, window_bounds = array<i64: 128, 128>}, {pipeline_mode = #tpu.pipeline_mode<synchronous>, transform_indices = @transform_17, window_bounds = array<i64: 1, 128>}, {pipeline_mode = #tpu.pipeline_mode<synchronous>, transform_indices = @transform_18, window_bounds = array<i64: 16, 128>}, {pipeline_mode = #tpu.pipeline_mode<synchronous>, transform_indices = @transform_19, window_bounds = array<i64: 2, 128>}]} {
    %c0_i32 = arith.constant 0 : i32
    %0 = arith.cmpi eq, %arg0, %c0_i32 : i32
    %1 = arith.extui %0 : i1 to i32
    %c0_i32_0 = arith.constant 0 : i32
    %2 = arith.cmpi ne, %1, %c0_i32_0 : i32
    scf.if %2 {
      %c0_69 = arith.constant 0 : index
      %c0_70 = arith.constant 0 : index
      %146 = vector.load %arg1[%c0_69, %c0_70] : memref<16x128xf32, #tpu.memory_space<vmem>>, vector<16x128xf32>
      %c0_71 = arith.constant 0 : index
      %c0_72 = arith.constant 0 : index
      %147 = vector.load %arg3[%c0_71, %c0_72] : memref<1x128xf32, #tpu.memory_space<vmem>>, vector<1x128xf32>
      %c0_73 = arith.constant 0 : index
      %c0_74 = arith.constant 0 : index
      %148 = vector.load %arg4[%c0_73, %c0_74] : memref<1x128xf32, #tpu.memory_space<vmem>>, vector<1x128xf32>
      %cst_75 = arith.constant dense<0.000000e+00> : vector<16xf32>
      %149 = vector.multi_reduction <add>, %146, %cst_75 [1] : vector<16x128xf32> to vector<16xf32>
      %150 = vector.shape_cast %149 : vector<16xf32> to vector<16x1xf32>
      %cst_76 = arith.constant 1.280000e+02 : f32
      %151 = vector.broadcast %cst_76 : f32 to vector<16x1xf32>
      %152 = arith.divf %150, %151 : vector<16x1xf32>
      %153 = arith.mulf %146, %146 : vector<16x128xf32>
      %cst_77 = arith.constant dense<0.000000e+00> : vector<16xf32>
      %154 = vector.multi_reduction <add>, %153, %cst_77 [1] : vector<16x128xf32> to vector<16xf32>
      %155 = vector.shape_cast %154 : vector<16xf32> to vector<16x1xf32>
      %cst_78 = arith.constant 1.280000e+02 : f32
      %156 = vector.broadcast %cst_78 : f32 to vector<16x1xf32>
      %157 = arith.divf %155, %156 : vector<16x1xf32>
      %158 = arith.mulf %152, %152 : vector<16x1xf32>
      %159 = arith.subf %157, %158 : vector<16x1xf32>
      %160 = vector.broadcast %152 : vector<16x1xf32> to vector<16x128xf32>
      %161 = arith.subf %146, %160 : vector<16x128xf32>
      %cst_79 = arith.constant 9.99999996E-13 : f32
      %162 = vector.broadcast %cst_79 : f32 to vector<16x1xf32>
      %163 = arith.addf %159, %162 : vector<16x1xf32>
      %164 = math.rsqrt %163 : vector<16x1xf32>
      %165 = vector.broadcast %164 : vector<16x1xf32> to vector<16x128xf32>
      %166 = arith.mulf %161, %165 : vector<16x128xf32>
      %167 = vector.broadcast %147 : vector<1x128xf32> to vector<16x128xf32>
      %168 = arith.mulf %166, %167 : vector<16x128xf32>
      %169 = vector.broadcast %148 : vector<1x128xf32> to vector<16x128xf32>
      %170 = arith.addf %168, %169 : vector<16x128xf32>
      %c0_80 = arith.constant 0 : index
      %c0_81 = arith.constant 0 : index
      %171 = vector.load %arg21[%c0_80, %c0_81] : memref<16x128xf32, #tpu.memory_space<vmem>>, vector<16x128xf32>
      tpu.vector_store %arg21[%c0_80, %c0_81], %170 {strides = array<i32>} : memref<16x128xf32, #tpu.memory_space<vmem>>, vector<16x128xf32>,
    } else {
    }
    %c0 = arith.constant 0 : index
    %c0_1 = arith.constant 0 : index
    %3 = vector.load %arg21[%c0, %c0_1] : memref<16x128xf32, #tpu.memory_space<vmem>>, vector<16x128xf32>
    %c0_2 = arith.constant 0 : index
    %c0_3 = arith.constant 0 : index
    %c0_4 = arith.constant 0 : index
    %4 = vector.load %arg2[%c0_2, %c0_3, %c0_4] : memref<2x8x8xf32, #tpu.memory_space<vmem>>, vector<2x8x8xf32>
    %5 = arith.truncf %3 : vector<16x128xf32> to vector<16x128xbf16>
    %c0_5 = arith.constant 0 : index
    %c0_6 = arith.constant 0 : index
    %c0_7 = arith.constant 0 : index
    %6 = vector.load %arg5[%c0_5, %c0_6, %c0_7] : memref<1x128x384xbf16, #tpu.memory_space<vmem>>, vector<1x128x384xbf16>
    %7 = vector.shape_cast %6 : vector<1x128x384xbf16> to vector<128x384xbf16>
    %cst = arith.constant dense<0.000000e+00> : vector<16x384xf32>
    %8 = tpu.matmul %5, %7, %cst {dimension_numbers = #tpu.dot_dimension_numbers<[1], [0], [0], [1], [0, 0, 1, 1], [], []>} : vector<16x128xbf16>, vector<128x384xbf16>, vector<16x384xf32> -> vector<16x384xf32>
    %c0_8 = arith.constant 0 : index
    %c0_9 = arith.constant 0 : index
    %c0_10 = arith.constant 0 : index
    %9 = vector.load %arg6[%c0_8, %c0_9, %c0_10] : memref<1x1x384xf32, #tpu.memory_space<vmem>>, vector<1x1x384xf32>
    %10 = vector.shape_cast %9 : vector<1x1x384xf32> to vector<1x384xf32>
    %11 = vector.broadcast %10 : vector<1x384xf32> to vector<16x384xf32>
    %12 = arith.addf %8, %11 : vector<16x384xf32>
    %13 = vector.shape_cast %12 : vector<16x384xf32> to vector<2x8x384xf32>
    %14 = arith.truncf %13 : vector<2x8x384xf32> to vector<2x8x384xbf16>
    %15 = vector.extract_strided_slice %14 {offsets = [0, 0, 0], sizes = [2, 8, 64], strides = [1, 1, 1]} : vector<2x8x384xbf16> to vector<2x8x64xbf16>
    %16 = vector.extract_strided_slice %14 {offsets = [0, 0, 128], sizes = [2, 8, 64], strides = [1, 1, 1]} : vector<2x8x384xbf16> to vector<2x8x64xbf16>
    %17 = vector.extract_strided_slice %14 {offsets = [0, 0, 256], sizes = [2, 8, 64], strides = [1, 1, 1]} : vector<2x8x384xbf16> to vector<2x8x64xbf16>
    "tpu.trace_start"() <{level = 10 : i32, message = "bqd,bkd->bqk"}> : () -> ()
    %cst_11 = arith.constant dense<0.000000e+00> : vector<2x8x8xf32>
    %18 = tpu.matmul %15, %16, %cst_11 {dimension_numbers = #tpu.dot_dimension_numbers<[2], [2], [1], [1], [0, 0, 0, 1, 1, 1], [0], [0]>} : vector<2x8x64xbf16>, vector<2x8x64xbf16>, vector<2x8x8xf32> -> vector<2x8x8xf32>
    "tpu.trace_stop"() : () -> ()
    %19 = arith.addf %18, %4 : vector<2x8x8xf32>
    %cst_12 = arith.constant dense<0xFF800000> : vector<2x8xf32>
    %20 = vector.multi_reduction <maximumf>, %19, %cst_12 [2] : vector<2x8x8xf32> to vector<2x8xf32>
    %21 = vector.shape_cast %20 : vector<2x8xf32> to vector<2x8x1xf32>
    %22 = vector.broadcast %21 : vector<2x8x1xf32> to vector<2x8x8xf32>
    %23 = arith.subf %19, %22 : vector<2x8x8xf32>
    %24 = math.exp %23 : vector<2x8x8xf32>
    %cst_13 = arith.constant dense<0.000000e+00> : vector<2x8xf32>
    %25 = vector.multi_reduction <add>, %24, %cst_13 [2] : vector<2x8x8xf32> to vector<2x8xf32>
    %26 = vector.shape_cast %25 : vector<2x8xf32> to vector<2x8x1xf32>
    %27 = tpu.reciprocal %26 {approx = true} : vector<2x8x1xf32> -> vector<2x8x1xf32>
    %28 = vector.broadcast %27 : vector<2x8x1xf32> to vector<2x8x8xf32>
    %29 = arith.mulf %24, %28 : vector<2x8x8xf32>
    %30 = arith.truncf %29 : vector<2x8x8xf32> to vector<2x8x8xbf16>
    "tpu.trace_start"() <{level = 10 : i32, message = "bqk,bkd->bqd"}> : () -> ()
    %cst_14 = arith.constant dense<0.000000e+00> : vector<2x8x64xf32>
    %31 = tpu.matmul %30, %17, %cst_14 {dimension_numbers = #tpu.dot_dimension_numbers<[2], [1], [1], [2], [0, 0, 0, 1, 1, 2], [0], [0]>} : vector<2x8x8xbf16>, vector<2x8x64xbf16>, vector<2x8x64xf32> -> vector<2x8x64xf32>
    "tpu.trace_stop"() : () -> ()
    %32 = vector.extract_strided_slice %14 {offsets = [0, 0, 64], sizes = [2, 8, 64], strides = [1, 1, 1]} : vector<2x8x384xbf16> to vector<2x8x64xbf16>
    %33 = vector.extract_strided_slice %14 {offsets = [0, 0, 192], sizes = [2, 8, 64], strides = [1, 1, 1]} : vector<2x8x384xbf16> to vector<2x8x64xbf16>
    %34 = vector.extract_strided_slice %14 {offsets = [0, 0, 320], sizes = [2, 8, 64], strides = [1, 1, 1]} : vector<2x8x384xbf16> to vector<2x8x64xbf16>
    "tpu.trace_start"() <{level = 10 : i32, message = "bqd,bkd->bqk"}> : () -> ()
    %cst_15 = arith.constant dense<0.000000e+00> : vector<2x8x8xf32>
    %35 = tpu.matmul %32, %33, %cst_15 {dimension_numbers = #tpu.dot_dimension_numbers<[2], [2], [1], [1], [0, 0, 0, 1, 1, 1], [0], [0]>} : vector<2x8x64xbf16>, vector<2x8x64xbf16>, vector<2x8x8xf32> -> vector<2x8x8xf32>
    "tpu.trace_stop"() : () -> ()
    %36 = arith.addf %35, %4 : vector<2x8x8xf32>
    %cst_16 = arith.constant dense<0xFF800000> : vector<2x8xf32>
    %37 = vector.multi_reduction <maximumf>, %36, %cst_16 [2] : vector<2x8x8xf32> to vector<2x8xf32>
    %38 = vector.shape_cast %37 : vector<2x8xf32> to vector<2x8x1xf32>
    %39 = vector.broadcast %38 : vector<2x8x1xf32> to vector<2x8x8xf32>
    %40 = arith.subf %36, %39 : vector<2x8x8xf32>
    %41 = math.exp %40 : vector<2x8x8xf32>
    %cst_17 = arith.constant dense<0.000000e+00> : vector<2x8xf32>
    %42 = vector.multi_reduction <add>, %41, %cst_17 [2] : vector<2x8x8xf32> to vector<2x8xf32>
    %43 = vector.shape_cast %42 : vector<2x8xf32> to vector<2x8x1xf32>
    %44 = tpu.reciprocal %43 {approx = true} : vector<2x8x1xf32> -> vector<2x8x1xf32>
    %45 = vector.broadcast %44 : vector<2x8x1xf32> to vector<2x8x8xf32>
    %46 = arith.mulf %41, %45 : vector<2x8x8xf32>
    %47 = arith.truncf %46 : vector<2x8x8xf32> to vector<2x8x8xbf16>
    "tpu.trace_start"() <{level = 10 : i32, message = "bqk,bkd->bqd"}> : () -> ()
    %cst_18 = arith.constant dense<0.000000e+00> : vector<2x8x64xf32>
    %48 = tpu.matmul %47, %34, %cst_18 {dimension_numbers = #tpu.dot_dimension_numbers<[2], [1], [1], [2], [0, 0, 0, 1, 1, 2], [0], [0]>} : vector<2x8x8xbf16>, vector<2x8x64xbf16>, vector<2x8x64xf32> -> vector<2x8x64xf32>
    "tpu.trace_stop"() : () -> ()
    %49 = tpu.concatenate %31, %48 in 2 : vector<2x8x64xf32>, vector<2x8x64xf32> -> vector<2x8x128xf32>
    %50 = vector.shape_cast %49 : vector<2x8x128xf32> to vector<16x128xf32>
    %51 = arith.truncf %50 : vector<16x128xf32> to vector<16x128xbf16>
    %c0_19 = arith.constant 0 : index
    %c0_20 = arith.constant 0 : index
    %c0_21 = arith.constant 0 : index
    %52 = vector.load %arg7[%c0_19, %c0_20, %c0_21] : memref<1x128x128xbf16, #tpu.memory_space<vmem>>, vector<1x128x128xbf16>
    %53 = vector.shape_cast %52 : vector<1x128x128xbf16> to vector<128x128xbf16>
    %cst_22 = arith.constant dense<0.000000e+00> : vector<16x128xf32>
    %54 = tpu.matmul %51, %53, %cst_22 {dimension_numbers = #tpu.dot_dimension_numbers<[1], [0], [0], [1], [0, 0, 1, 1], [], []>} : vector<16x128xbf16>, vector<128x128xbf16>, vector<16x128xf32> -> vector<16x128xf32>
    %c0_23 = arith.constant 0 : index
    %c0_24 = arith.constant 0 : index
    %c0_25 = arith.constant 0 : index
    %55 = vector.load %arg8[%c0_23, %c0_24, %c0_25] : memref<1x1x128xf32, #tpu.memory_space<vmem>>, vector<1x1x128xf32>
    %56 = vector.shape_cast %55 : vector<1x1x128xf32> to vector<1x128xf32>
    %57 = vector.broadcast %56 : vector<1x128xf32> to vector<16x128xf32>
    %58 = arith.addf %54, %57 : vector<16x128xf32>
    %59 = arith.addf %3, %58 : vector<16x128xf32>
    %c0_26 = arith.constant 0 : index
    %c0_27 = arith.constant 0 : index
    %c0_28 = arith.constant 0 : index
    %60 = vector.load %arg9[%c0_26, %c0_27, %c0_28] : memref<1x1x128xf32, #tpu.memory_space<vmem>>, vector<1x1x128xf32>
    %61 = vector.shape_cast %60 : vector<1x1x128xf32> to vector<1x128xf32>
    %c0_29 = arith.constant 0 : index
    %c0_30 = arith.constant 0 : index
    %c0_31 = arith.constant 0 : index
    %62 = vector.load %arg10[%c0_29, %c0_30, %c0_31] : memref<1x1x128xf32, #tpu.memory_space<vmem>>, vector<1x1x128xf32>
    %63 = vector.shape_cast %62 : vector<1x1x128xf32> to vector<1x128xf32>
    %cst_32 = arith.constant dense<0.000000e+00> : vector<16xf32>
    %64 = vector.multi_reduction <add>, %59, %cst_32 [1] : vector<16x128xf32> to vector<16xf32>
    %65 = vector.shape_cast %64 : vector<16xf32> to vector<16x1xf32>
    %cst_33 = arith.constant 1.280000e+02 : f32
    %66 = vector.broadcast %cst_33 : f32 to vector<16x1xf32>
    %67 = arith.divf %65, %66 : vector<16x1xf32>
    %68 = arith.mulf %59, %59 : vector<16x128xf32>
    %cst_34 = arith.constant dense<0.000000e+00> : vector<16xf32>
    %69 = vector.multi_reduction <add>, %68, %cst_34 [1] : vector<16x128xf32> to vector<16xf32>
    %70 = vector.shape_cast %69 : vector<16xf32> to vector<16x1xf32>
    %cst_35 = arith.constant 1.280000e+02 : f32
    %71 = vector.broadcast %cst_35 : f32 to vector<16x1xf32>
    %72 = arith.divf %70, %71 : vector<16x1xf32>
    %73 = arith.mulf %67, %67 : vector<16x1xf32>
    %74 = arith.subf %72, %73 : vector<16x1xf32>
    %75 = vector.broadcast %67 : vector<16x1xf32> to vector<16x128xf32>
    %76 = arith.subf %59, %75 : vector<16x128xf32>
    %cst_36 = arith.constant 9.99999996E-13 : f32
    %77 = vector.broadcast %cst_36 : f32 to vector<16x1xf32>
    %78 = arith.addf %74, %77 : vector<16x1xf32>
    %79 = math.rsqrt %78 : vector<16x1xf32>
    %80 = vector.broadcast %79 : vector<16x1xf32> to vector<16x128xf32>
    %81 = arith.mulf %76, %80 : vector<16x128xf32>
    %82 = vector.broadcast %61 : vector<1x128xf32> to vector<16x128xf32>
    %83 = arith.mulf %81, %82 : vector<16x128xf32>
    %84 = vector.broadcast %63 : vector<1x128xf32> to vector<16x128xf32>
    %85 = arith.addf %83, %84 : vector<16x128xf32>
    %86 = arith.truncf %85 : vector<16x128xf32> to vector<16x128xbf16>
    %c0_37 = arith.constant 0 : index
    %c0_38 = arith.constant 0 : index
    %c0_39 = arith.constant 0 : index
    %87 = vector.load %arg11[%c0_37, %c0_38, %c0_39] : memref<1x128x512xbf16, #tpu.memory_space<vmem>>, vector<1x128x512xbf16>
    %88 = vector.shape_cast %87 : vector<1x128x512xbf16> to vector<128x512xbf16>
    %cst_40 = arith.constant dense<0.000000e+00> : vector<16x512xf32>
    %89 = tpu.matmul %86, %88, %cst_40 {dimension_numbers = #tpu.dot_dimension_numbers<[1], [0], [0], [1], [0, 0, 1, 1], [], []>} : vector<16x128xbf16>, vector<128x512xbf16>, vector<16x512xf32> -> vector<16x512xf32>
    %c0_41 = arith.constant 0 : index
    %c0_42 = arith.constant 0 : index
    %c0_43 = arith.constant 0 : index
    %90 = vector.load %arg12[%c0_41, %c0_42, %c0_43] : memref<1x1x512xf32, #tpu.memory_space<vmem>>, vector<1x1x512xf32>
    %91 = vector.shape_cast %90 : vector<1x1x512xf32> to vector<1x512xf32>
    %92 = vector.broadcast %91 : vector<1x512xf32> to vector<16x512xf32>
    %93 = arith.addf %89, %92 : vector<16x512xf32>
    %94 = arith.mulf %93, %93 : vector<16x512xf32>
    %95 = arith.mulf %93, %94 : vector<16x512xf32>
    %cst_44 = arith.constant 4.471500e-02 : f32
    %96 = vector.broadcast %cst_44 : f32 to vector<16x512xf32>
    %97 = arith.mulf %96, %95 : vector<16x512xf32>
    %98 = arith.addf %93, %97 : vector<16x512xf32>
    %cst_45 = arith.constant 0.797884583 : f32
    %99 = vector.broadcast %cst_45 : f32 to vector<16x512xf32>
    %100 = arith.mulf %99, %98 : vector<16x512xf32>
    %101 = math.tanh %100 : vector<16x512xf32>
    %cst_46 = arith.constant 1.000000e+00 : f32
    %102 = vector.broadcast %cst_46 : f32 to vector<16x512xf32>
    %103 = arith.addf %102, %101 : vector<16x512xf32>
    %cst_47 = arith.constant 5.000000e-01 : f32
    %104 = vector.broadcast %cst_47 : f32 to vector<16x512xf32>
    %105 = arith.mulf %104, %103 : vector<16x512xf32>
    %106 = arith.mulf %93, %105 : vector<16x512xf32>
    %107 = arith.truncf %106 : vector<16x512xf32> to vector<16x512xbf16>
    %c0_48 = arith.constant 0 : index
    %c0_49 = arith.constant 0 : index
    %c0_50 = arith.constant 0 : index
    %108 = vector.load %arg13[%c0_48, %c0_49, %c0_50] : memref<1x512x128xbf16, #tpu.memory_space<vmem>>, vector<1x512x128xbf16>
    %109 = vector.shape_cast %108 : vector<1x512x128xbf16> to vector<512x128xbf16>
    %cst_51 = arith.constant dense<0.000000e+00> : vector<16x128xf32>
    %110 = tpu.matmul %107, %109, %cst_51 {dimension_numbers = #tpu.dot_dimension_numbers<[1], [0], [0], [1], [0, 0, 1, 1], [], []>} : vector<16x512xbf16>, vector<512x128xbf16>, vector<16x128xf32> -> vector<16x128xf32>
    %c0_52 = arith.constant 0 : index
    %c0_53 = arith.constant 0 : index
    %c0_54 = arith.constant 0 : index
    %111 = vector.load %arg14[%c0_52, %c0_53, %c0_54] : memref<1x1x128xf32, #tpu.memory_space<vmem>>, vector<1x1x128xf32>
    %112 = vector.shape_cast %111 : vector<1x1x128xf32> to vector<1x128xf32>
    %113 = vector.broadcast %112 : vector<1x128xf32> to vector<16x128xf32>
    %114 = arith.addf %110, %113 : vector<16x128xf32>
    %115 = arith.addf %85, %114 : vector<16x128xf32>
    %c0_55 = arith.constant 0 : index
    %c0_56 = arith.constant 0 : index
    %c0_57 = arith.constant 0 : index
    %116 = vector.load %arg15[%c0_55, %c0_56, %c0_57] : memref<1x1x128xf32, #tpu.memory_space<vmem>>, vector<1x1x128xf32>
    %117 = vector.shape_cast %116 : vector<1x1x128xf32> to vector<1x128xf32>
    %c0_58 = arith.constant 0 : index
    %c0_59 = arith.constant 0 : index
    %c0_60 = arith.constant 0 : index
    %118 = vector.load %arg16[%c0_58, %c0_59, %c0_60] : memref<1x1x128xf32, #tpu.memory_space<vmem>>, vector<1x1x128xf32>
    %119 = vector.shape_cast %118 : vector<1x1x128xf32> to vector<1x128xf32>
    %cst_61 = arith.constant dense<0.000000e+00> : vector<16xf32>
    %120 = vector.multi_reduction <add>, %115, %cst_61 [1] : vector<16x128xf32> to vector<16xf32>
    %121 = vector.shape_cast %120 : vector<16xf32> to vector<16x1xf32>
    %cst_62 = arith.constant 1.280000e+02 : f32
    %122 = vector.broadcast %cst_62 : f32 to vector<16x1xf32>
    %123 = arith.divf %121, %122 : vector<16x1xf32>
    %124 = arith.mulf %115, %115 : vector<16x128xf32>
    %cst_63 = arith.constant dense<0.000000e+00> : vector<16xf32>
    %125 = vector.multi_reduction <add>, %124, %cst_63 [1] : vector<16x128xf32> to vector<16xf32>
    %126 = vector.shape_cast %125 : vector<16xf32> to vector<16x1xf32>
    %cst_64 = arith.constant 1.280000e+02 : f32
    %127 = vector.broadcast %cst_64 : f32 to vector<16x1xf32>
    %128 = arith.divf %126, %127 : vector<16x1xf32>
    %129 = arith.mulf %123, %123 : vector<16x1xf32>
    %130 = arith.subf %128, %129 : vector<16x1xf32>
    %131 = vector.broadcast %123 : vector<16x1xf32> to vector<16x128xf32>
    %132 = arith.subf %115, %131 : vector<16x128xf32>
    %cst_65 = arith.constant 9.99999996E-13 : f32
    %133 = vector.broadcast %cst_65 : f32 to vector<16x1xf32>
    %134 = arith.addf %130, %133 : vector<16x1xf32>
    %135 = math.rsqrt %134 : vector<16x1xf32>
    %136 = vector.broadcast %135 : vector<16x1xf32> to vector<16x128xf32>
    %137 = arith.mulf %132, %136 : vector<16x128xf32>
    %138 = vector.broadcast %117 : vector<1x128xf32> to vector<16x128xf32>
    %139 = arith.mulf %137, %138 : vector<16x128xf32>
    %140 = vector.broadcast %119 : vector<1x128xf32> to vector<16x128xf32>
    %141 = arith.addf %139, %140 : vector<16x128xf32>
    %c0_66 = arith.constant 0 : index
    %c0_67 = arith.constant 0 : index
    %142 = vector.load %arg21[%c0_66, %c0_67] : memref<16x128xf32, #tpu.memory_space<vmem>>, vector<16x128xf32>
    tpu.vector_store %arg21[%c0_66, %c0_67], %141 {strides = array<i32>} : memref<16x128xf32, #tpu.memory_space<vmem>>, vector<16x128xf32>,
    %c1_i32 = arith.constant 1 : i32
    %143 = arith.cmpi eq, %arg0, %c1_i32 : i32
    %144 = arith.extui %143 : i1 to i32
    %c0_i32_68 = arith.constant 0 : i32
    %145 = arith.cmpi ne, %144, %c0_i32_68 : i32
    scf.if %145 {
      %c0_69 = arith.constant 0 : index
      %c0_70 = arith.constant 0 : index
      %146 = vector.load %arg19[%c0_69, %c0_70] : memref<16x128xf32, #tpu.memory_space<vmem>>, vector<16x128xf32>
      tpu.vector_store %arg19[%c0_69, %c0_70], %141 {strides = array<i32>} : memref<16x128xf32, #tpu.memory_space<vmem>>, vector<16x128xf32>,
      %147 = vector.shape_cast %141 : vector<16x128xf32> to vector<2x8x128xf32>
      %148 = vector.extract_strided_slice %147 {offsets = [0, 0, 0], sizes = [2, 1, 128], strides = [1, 1, 1]} : vector<2x8x128xf32> to vector<2x1x128xf32>
      %149 = vector.shape_cast %148 : vector<2x1x128xf32> to vector<2x128xf32>
      %150 = arith.truncf %149 : vector<2x128xf32> to vector<2x128xbf16>
      %c0_71 = arith.constant 0 : index
      %c0_72 = arith.constant 0 : index
      %151 = vector.load %arg17[%c0_71, %c0_72] : memref<128x128xbf16, #tpu.memory_space<vmem>>, vector<128x128xbf16>
      %cst_73 = arith.constant dense<0.000000e+00> : vector<2x128xf32>
      %152 = tpu.matmul %150, %151, %cst_73 {dimension_numbers = #tpu.dot_dimension_numbers<[1], [0], [0], [1], [0, 0, 1, 1], [], []>} : vector<2x128xbf16>, vector<128x128xbf16>, vector<2x128xf32> -> vector<2x128xf32>
      %c0_74 = arith.constant 0 : index
      %c0_75 = arith.constant 0 : index
      %153 = vector.load %arg18[%c0_74, %c0_75] : memref<1x128xf32, #tpu.memory_space<vmem>>, vector<1x128xf32>
      %154 = vector.broadcast %153 : vector<1x128xf32> to vector<2x128xf32>
      %155 = arith.addf %152, %154 : vector<2x128xf32>
      %156 = math.tanh %155 : vector<2x128xf32>
      %c0_76 = arith.constant 0 : index
      %c0_77 = arith.constant 0 : index
      %157 = vector.load %arg20[%c0_76, %c0_77] : memref<2x128xf32, #tpu.memory_space<vmem>>, vector<2x128xf32>
      tpu.vector_store %arg20[%c0_76, %c0_77], %156 {strides = array<i32>} : memref<2x128xf32, #tpu.memory_space<vmem>>, vector<2x128xf32>,
    } else {
    }
    return
  }
  func.func @transform_0(%arg0: i32) -> (i32, i32) {
    %c0_i32 = arith.constant 0 : i32
    %c0_i32_0 = arith.constant 0 : i32
    %c0_i32_1 = arith.constant 0 : i32
    return %c0_i32, %c0_i32_0 : i32, i32
  }
  func.func @transform_1(%arg0: i32) -> (i32, i32, i32) {
    %c0_i32 = arith.constant 0 : i32
    %c0_i32_0 = arith.constant 0 : i32
    %c0_i32_1 = arith.constant 0 : i32
    %c0_i32_2 = arith.constant 0 : i32
    return %c0_i32, %c0_i32_0, %c0_i32_1 : i32, i32, i32
  }
  func.func @transform_2(%arg0: i32) -> (i32, i32) {
    %c0_i32 = arith.constant 0 : i32
    %c0_i32_0 = arith.constant 0 : i32
    %c0_i32_1 = arith.constant 0 : i32
    return %c0_i32, %c0_i32_0 : i32, i32
  }
  func.func @transform_3(%arg0: i32) -> (i32, i32) {
    %c0_i32 = arith.constant 0 : i32
    %c0_i32_0 = arith.constant 0 : i32
    %c0_i32_1 = arith.constant 0 : i32
    return %c0_i32, %c0_i32_0 : i32, i32
  }
  func.func @transform_4(%arg0: i32) -> (i32, i32, i32) {
    %c0_i32 = arith.constant 0 : i32
    %c0_i32_0 = arith.constant 0 : i32
    %c0_i32_1 = arith.constant 0 : i32
    return %arg0, %c0_i32, %c0_i32_0 : i32, i32, i32
  }
  func.func @transform_5(%arg0: i32) -> (i32, i32, i32) {
    %c0_i32 = arith.constant 0 : i32
    %c0_i32_0 = arith.constant 0 : i32
    %c0_i32_1 = arith.constant 0 : i32
    return %arg0, %c0_i32, %c0_i32_0 : i32, i32, i32
  }
  func.func @transform_6(%arg0: i32) -> (i32, i32, i32) {
    %c0_i32 = arith.constant 0 : i32
    %c0_i32_0 = arith.constant 0 : i32
    %c0_i32_1 = arith.constant 0 : i32
    return %arg0, %c0_i32, %c0_i32_0 : i32, i32, i32
  }
  func.func @transform_7(%arg0: i32) -> (i32, i32, i32) {
    %c0_i32 = arith.constant 0 : i32
    %c0_i32_0 = arith.constant 0 : i32
    %c0_i32_1 = arith.constant 0 : i32
    return %arg0, %c0_i32, %c0_i32_0 : i32, i32, i32
  }
  func.func @transform_8(%arg0: i32) -> (i32, i32, i32) {
    %c0_i32 = arith.constant 0 : i32
    %c0_i32_0 = arith.constant 0 : i32
    %c0_i32_1 = arith.constant 0 : i32
    return %arg0, %c0_i32, %c0_i32_0 : i32, i32, i32
  }
  func.func @transform_9(%arg0: i32) -> (i32, i32, i32) {
    %c0_i32 = arith.constant 0 : i32
    %c0_i32_0 = arith.constant 0 : i32
    %c0_i32_1 = arith.constant 0 : i32
    return %arg0, %c0_i32, %c0_i32_0 : i32, i32, i32
  }
  func.func @transform_10(%arg0: i32) -> (i32, i32, i32) {
    %c0_i32 = arith.constant 0 : i32
    %c0_i32_0 = arith.constant 0 : i32
    %c0_i32_1 = arith.constant 0 : i32
    return %arg0, %c0_i32, %c0_i32_0 : i32, i32, i32
  }
  func.func @transform_11(%arg0: i32) -> (i32, i32, i32) {
    %c0_i32 = arith.constant 0 : i32
    %c0_i32_0 = arith.constant 0 : i32
    %c0_i32_1 = arith.constant 0 : i32
    return %arg0, %c0_i32, %c0_i32_0 : i32, i32, i32
  }
  func.func @transform_12(%arg0: i32) -> (i32, i32, i32) {
    %c0_i32 = arith.constant 0 : i32
    %c0_i32_0 = arith.constant 0 : i32
    %c0_i32_1 = arith.constant 0 : i32
    return %arg0, %c0_i32, %c0_i32_0 : i32, i32, i32
  }
  func.func @transform_13(%arg0: i32) -> (i32, i32, i32) {
    %c0_i32 = arith.constant 0 : i32
    %c0_i32_0 = arith.constant 0 : i32
    %c0_i32_1 = arith.constant 0 : i32
    return %arg0, %c0_i32, %c0_i32_0 : i32, i32, i32
  }
  func.func @transform_14(%arg0: i32) -> (i32, i32, i32) {
    %c0_i32 = arith.constant 0 : i32
    %c0_i32_0 = arith.constant 0 : i32
    %c0_i32_1 = arith.constant 0 : i32
    return %arg0, %c0_i32, %c0_i32_0 : i32, i32, i32
  }
  func.func @transform_15(%arg0: i32) -> (i32, i32, i32) {
    %c0_i32 = arith.constant 0 : i32
    %c0_i32_0 = arith.constant 0 : i32
    %c0_i32_1 = arith.constant 0 : i32
    return %arg0, %c0_i32, %c0_i32_0 : i32, i32, i32
  }
  func.func @transform_16(%arg0: i32) -> (i32, i32) {
    %c0_i32 = arith.constant 0 : i32
    %c0_i32_0 = arith.constant 0 : i32
    %c0_i32_1 = arith.constant 0 : i32
    return %c0_i32, %c0_i32_0 : i32, i32
  }
  func.func @transform_17(%arg0: i32) -> (i32, i32) {
    %c0_i32 = arith.constant 0 : i32
    %c0_i32_0 = arith.constant 0 : i32
    %c0_i32_1 = arith.constant 0 : i32
    return %c0_i32, %c0_i32_0 : i32, i32
  }
  func.func @transform_18(%arg0: i32) -> (i32, i32) {
    %c0_i32 = arith.constant 0 : i32
    %c0_i32_0 = arith.constant 0 : i32
    %c0_i32_1 = arith.constant 0 : i32
    return %c0_i32, %c0_i32_0 : i32, i32
  }
  func.func @transform_19(%arg0: i32) -> (i32, i32) {
    %c0_i32 = arith.constant 0 : i32
    %c0_i32_0 = arith.constant 0 : i32
    %c0_i32_1 = arith.constant 0 : i32
    return %c0_i32, %c0_i32_0 : i32, i32
  }
}

</mosaic_0001>

<bundles_post_ra>
// kernel: transformers_forward.1
= control target key start
LH: loop header
LB: loop body
LE: loop exit
PB: predicated region body
PF: predicated region fallthrough
CT: control target
= control target key end

     0   :  { %s4363_s0 = inlined_call_operand.vmem [shape: f32[16,128], index: 0, kind: input, shape index: {}]   ;;  %s4364_s1 = inlined_call_operand.vmem [shape: f32[2,8,8], index: 1, kind: input, shape index: {}]   ;;  %s4365_s2 = inlined_call_operand.vmem [shape: f32[1,128], index: 2, kind: input, shape index: {}]   ;;  %s4366_s3 = inlined_call_operand.vmem [shape: f32[1,128], index: 3, kind: input, shape index: {}]   ;;  %s4367_s4 = inlined_call_operand.hbm [shape: bf16[2,128,384], index: 4, kind: input, shape index: {}]   ;;  %s4368_s5 = inlined_call_operand.vmem [shape: f32[2,1,384], index: 5, kind: input, shape index: {}]   ;;  %s4369_s6 = inlined_call_operand.vmem [shape: bf16[2,128,128], index: 6, kind: input, shape index: {}]   ;;  %s4370_s7 = inlined_call_operand.vmem [shape: f32[2,1,128], index: 7, kind: input, shape index: {}]   ;;  %s4371_s8 = inlined_call_operand.vmem [shape: f32[2,1,128], index: 8, kind: input, shape index: {}]   ;;  %s4372_s9 = inlined_call_operand.vmem [shape: f32[2,1,128], index: 9, kind: input, shape index: {}]   ;;  %s4373_s10 = inlined_call_operand.hbm [shape: bf16[2,128,512], index: 10, kind: input, shape index: {}]   ;;  %s4374_s11 = inlined_call_operand.vmem [shape: f32[2,1,512], index: 11, kind: input, shape index: {}]   ;;  %s4375_s12 = inlined_call_operand.hbm [shape: bf16[2,512,128], index: 12, kind: input, shape index: {}]   ;;  %s4376_s13 = inlined_call_operand.vmem [shape: f32[2,1,128], index: 13, kind: input, shape index: {}]   ;;  %s4377_s14 = inlined_call_operand.vmem [shape: f32[2,1,128], index: 14, kind: input, shape index: {}]   ;;  %s4378_s15 = inlined_call_operand.vmem [shape: f32[2,1,128], index: 15, kind: input, shape index: {}]   ;;  %s4379_s16 = inlined_call_operand.vmem [shape: bf16[128,128], index: 16, kind: input, shape index: {}]   ;;  %s4380_s17 = inlined_call_operand.vmem [shape: f32[1,128], index: 17, kind: input, shape index: {}]   ;;  %s4381_s18 = inlined_call_operand.vmem [shape: f32[16,128], index: 18, kind: output, shape index: {0}]   ;;  %s4382_s19 = inlined_call_operand.hbm [shape: f32[2,128], index: 19, kind: output, shape index: {1}]  }
   0x1   :  { %4394 = sst [smem:[#allocation16_spill]] %s4363_s0 }
   0x2   :  { %4395 = sst [smem:[#allocation17_spill]] %s4364_s1 }
   0x3   :  { %4396 = sst [smem:[#allocation18_spill]] %s4365_s2 }
   0x4   :  { %4397 = sst [smem:[#allocation19_spill]] %s4366_s3 }
   0x5   :  { %4398 = sst [smem:[#allocation20_spill]] %s4367_s4 }
   0x6   :  { %4399 = sst [smem:[#allocation21_spill]] %s4368_s5 }
   0x7   :  { %4400 = sst [smem:[#allocation22_spill]] %s4369_s6 }
   0x8   :  { %4401 = sst [smem:[#allocation23_spill]] %s4373_s10 }
   0x9   :  { %4402 = sst [smem:[#allocation24_spill]] %s4375_s12 }
   0xa   :  { %4403 = sst [smem:[#allocation25_spill]] %s4378_s15 }
   0xb   :  { %4404 = sst [smem:[#allocation26_spill]] %s4379_s16 }
   0xc   :  { %4405 = sst [smem:[#allocation27_spill]] %s4380_s17 }
   0xd   :  { %4406 = sst [smem:[#allocation28_spill]] %s4381_s18 }
   0xe   :  { %4407 = sst [smem:[#allocation29_spill]] %s4382_s19 }
   0xf   :  { %25 = vsyncpa [#allocation4], 0 }
  0x10   :  { %27 = vsyncpa [#allocation4 + $0x1], 0 }
  0x11   :  { %28 = vsyncpa [#allocation7], 0 }
  0x12   :  { %30 = vsyncpa [#allocation7 + $0x1], 0 }
  0x13   :  { %31 = vsyncpa [#allocation5], 0  ;;  %s3719_s0 = smov 0   ;;  %s3721_s30 = smov 0  }
  0x14   :  { %s3723_s20 = smov 0   ;;  %s3725_s21 = smov 0  }
  0x15 LB: > { %4408 = sst [smem:[#allocation13_spill]] %s3597_s20  ;;  %s3738_s1 = sadd.s32 4294967295, %s3601_s21   ;;  %s3601_s21 = sphi %s3725_s21, %s4438_s21   ;;  %s3597_s20 = sphi %s3723_s20, %s4440_s20   ;;  %s3593_s30 = sphi %s3721_s30, %s4442_s30   ;;  %s3589_s0 = sphi %s3719_s0, %s4441_s0  }
  0x16   : > { %s3741_s22 = sadd.s32 1, %s3601_s21   ;;  %s128_s23 = sadd.s32 1, %s3597_s20 }
  0x17   : > { %4409 = sst [smem:[#allocation14_spill]] %s3741_s22  ;;  %s125_s2 = ssub.s32 %s3601_s21, %s3741_s22 }
  0x18   : > { %p126_p0 = scmp.eq.s32.totalorder %s125_s2, 0  ;;  %p135_p1 = scmp.ne.s32.totalorder %s3597_s20, %s3593_s30 }
  0x19   : > { %p136_p2 = scmp.eq.s32.totalorder %s3601_s21, 0  ;;  %p141_p3 = scmp.ne.s32.totalorder %s3593_s30, %s3589_s0 }
  0x1a   : > { %s3751_s24 = scalar_select %p126_p0, %s3597_s20, %s128_s23  }
  0x1b   : > { %p137_p4 = por %p136_p2, %p135_p1  ;;  %p142_p5 = scmp.eq.s32.totalorder %s3738_s1, 0 }
  0x1c   : > { %4410 = sst [smem:[#allocation15_spill]] %s3751_s24  ;;  %p3216_p6 = scmp.lt.s32.totalorder %s3601_s21, 2 }
  0x1d   : > { %p3755_p7 = por %p142_p5, %p141_p3  ;;  %s3760_s3 = sand.u32 1, %s3597_s20  }
  0x1e   : > { %p3762_p8 = pnand %p3216_p6, %p137_p4  ;;  %s607_s27 = sand.u32 1, %s3601_s21  }
  0x1f   : > { %s4411_s25 = scalar_select %p3755_p7, 1, 0 }
  0x20   : > { %s4389_s28 = sshll.u32 %s3760_s3, 8  ;;  %s4390_s29 = sshll.u32 %s3601_s21, 12 }
  0x21   : > { %s611_s0 = scalar_lea.vmem [#allocation6], %s4389_s28  ;;  %s4413_s10 = sld [smem:[#allocation23_spill]] }
  0x22   : > { %s618_s2 = sshll.u32 %s611_s0, 4  ;;  %s3780_s20 = scalar_lea.sflag [#allocation7], %s607_s27  ;;  %s3778_s2 = int_to_ptr.vmem [resolvable:$true] %s618_s2 }
  0x23   : > { %p3786_p10 = pneg %p3762_p8 }
  0x27   : > { %s3776_s22 = scalar_lea.hbm %s4413_s10, %s4390_s29  ;;  %s3448_s23 = scalar_lea.hbm %s4413_s10, 8192 }
  0x28   : > { %s3443_s19 = scalar_lea.hbm %s3776_s22, 4096  ;;  %p3449_p13 = scmp.lt.u32.totalorder %s3776_s22, %s4413_s10 }
  0x29   : > { %p3444_p9 = scmp.ne.s32.totalorder %s3776_s22, %s3443_s19  ;;  %p3450_p0 = scmp.lt.u32.totalorder %s3448_s23, %s3443_s19 }
  0x2a   : > { %p3452_p2 = scmp.lt.u32.totalorder %s3443_s19, %s3776_s22 }
  0x2b   : > { %p3446_p11 = pnand %p3786_p10, %p3444_p9  ;;  %p3451_p1 = por %p3450_p0, %p3449_p13 }
  0x2d   : > { %p3447_p12 = pneg %p3446_p11  ;;  %p3453_p3 = por %p3452_p2, %p3451_p1 }
  0x2f   : > { %p3454_p4 = pnand %p3453_p3, %p3447_p12 }
  0x31   : > { %3457 = shalt.err (!%p3454_p4)
}
  0x32   : > { %s3458_s27 = scalar_lea.vmem %s3778_s2, 4096  ;;  %s3603_s24 = smov [#allocation6]  }
  0x33   : > { %p3459_p5 = scmp.ne.s32.totalorder %s3778_s2, %s3458_s27  ;;  %s3463_s0 = sshll.u32 %s3603_s24, 4  ;;  %s3464_s0 = int_to_ptr.vmem [resolvable:$false] %s3463_s0 }
  0x34   : > { %s3465_s17 = scalar_lea.vmem %s3464_s0, 8192  ;;  %p3466_p11 = scmp.lt.s32.totalorder %s3778_s2, %s3464_s0 }
  0x35   : > { %p3461_p6 = pnand %p3459_p5, %p3786_p10  ;;  %p3467_p7 = scmp.lt.s32.totalorder %s3465_s17, %s3458_s27 }
  0x37   : > { %p3462_p9 = pneg %p3461_p6  ;;  %p3468_p13 = por %p3467_p7, %p3466_p11 }
  0x39   : > { %p3469_p0 = pnand %p3468_p13, %p3462_p9 }
  0x3b   : > { %3472 = shalt.err (!%p3469_p0)
}
  0x3c   : > { %s3604_s19 = smov 256   ;;  %s3605_s29 = smov 16  }
  0x3d   : > { %3212 = dma.hbm_to_vmem [thread:$0]  (!%p3762_p8), %s3776_s22, 4096, %s3778_s2, %s3780_s20, %s3604_s19, %s3604_s19, %s3605_s29  }
  0x3e   : > { %s4415_s23 = sshll.u32 %s3601_s21, 12  ;;  %s4416_s12 = sld [smem:[#allocation24_spill]] }
  0x3f   : > { %s4417_s17 = sshll.u32 %s3760_s3, 8  ;;  %p2861_p7 = scmp.ge.s32.totalorder %s3601_s21, 1 }
  0x40   : > { %s639_s10 = scalar_lea.vmem [#allocation8], %s4417_s17  ;;  %p672_p12 = scmp.lt.s32.totalorder %s3601_s21, 3 }
  0x41   : > { %s646_s16 = sshll.u32 %s639_s10, 4  ;;  %s3192_s18 = smul.u32 192, %s3760_s3  ;;  %s3820_s16 = int_to_ptr.vmem [resolvable:$true] %s646_s16 }
  0x42   : > { %p3824_p1 = pnand %p2861_p7, %p672_p12  ;;  %s3193_s22 = smul.u32 3072, %s3601_s21 }
  0x43   : > { %s4419_s4 = sld [smem:[#allocation20_spill]]  ;;  %s557_s10 = scalar_lea.vmem [#allocation3], %s3192_s18 }
  0x44   : > { %s3815_s0 = scalar_lea.hbm %s4416_s12, %s4415_s23  ;;  %s564_s23 = sshll.u32 %s557_s10, 4  ;;  %s3834_s23 = int_to_ptr.vmem [resolvable:$true] %s564_s23 }
  0x45   : > { %s4418_s15 = scalar_select %p3824_p1, 1, 0 }
  0x46   : > { %s554_s27 = scalar_lea.sflag [#allocation4], %s3760_s3 }
  0x49   : > { %s3832_s29 = scalar_lea.hbm %s4419_s4, %s3193_s22  ;;  %s3478_s2 = scalar_lea.hbm %s4419_s4, 6144 }
  0x4a   : > { %s3473_s24 = scalar_lea.hbm %s3832_s29, 3072  ;;  %p3479_p5 = scmp.lt.u32.totalorder %s3832_s29, %s4419_s4 }
  0x4b   : > { %p3474_p2 = scmp.ne.s32.totalorder %s3832_s29, %s3473_s24  ;;  %p3480_p6 = scmp.lt.u32.totalorder %s3478_s2, %s3473_s24 }
  0x4c   : > { %p3482_p11 = scmp.lt.u32.totalorder %s3473_s24, %s3832_s29 }
  0x4d   : > { %p3476_p3 = pnand %p3474_p2, %p3786_p10  ;;  %p3481_p9 = por %p3480_p6, %p3479_p5 }
  0x4f   : > { %p3477_p4 = pneg %p3476_p3  ;;  %p3483_p13 = por %p3482_p11, %p3481_p9 }
  0x51   : > { %p3484_p0 = pnand %p3483_p13, %p3477_p4 }
  0x53   : > { %3487 = shalt.err (!%p3484_p0)
}
  0x54   : > { %s3488_s18 = scalar_lea.vmem %s3834_s23, 3072  ;;  %s3606_s10 = smov [#allocation3]  }
  0x55   : > { %p3489_p7 = scmp.ne.s32.totalorder %s3834_s23, %s3488_s18  ;;  %s3493_s21 = sshll.u32 %s3606_s10, 4  ;;  %s3494_s21 = int_to_ptr.vmem [resolvable:$false] %s3493_s21 }
  0x56   : > { %s3495_s17 = scalar_lea.vmem %s3494_s21, 6144  ;;  %p3496_p3 = scmp.lt.s32.totalorder %s3834_s23, %s3494_s21 }
  0x57   : > { %p3491_p12 = pnand %p3489_p7, %p3786_p10  ;;  %p3497_p1 = scmp.lt.s32.totalorder %s3495_s17, %s3488_s18 }
  0x59   : > { %p3492_p2 = pneg %p3491_p12  ;;  %p3498_p5 = por %p3497_p1, %p3496_p3 }
  0x5b   : > { %p3499_p6 = pnand %p3498_p5, %p3492_p2 }
  0x5d   : > { %3502 = shalt.err (!%p3499_p6)
}
  0x5e   : > { %s3607_s24 = smov 192   ;;  %s3608_s2 = smov 12  }
  0x5f   : > { %3209 = dma.hbm_to_vmem [thread:$0]  (!%p3762_p8), %s3832_s29, 3072, %s3834_s23, %s554_s27, %s3607_s24, %s3607_s24, %s3608_s2  }
  0x60   : > { %s3503_s22 = scalar_lea.hbm %s3815_s0, 4096  ;;  %s3508_s10 = scalar_lea.hbm %s4416_s12, 8192 }
  0x61   : > { %p3504_p4 = scmp.ne.s32.totalorder %s3815_s0, %s3503_s22  ;;  %p3509_p11 = scmp.lt.u32.totalorder %s3815_s0, %s4416_s12 }
  0x62   : > { %p3510_p13 = scmp.lt.u32.totalorder %s3508_s10, %s3503_s22  ;;  %p3512_p7 = scmp.lt.u32.totalorder %s3503_s22, %s3815_s0 }
  0x63   : > { %p3506_p1 = pnand %p3504_p4, %p3786_p10 }
  0x64   : > { %p3511_p0 = por %p3510_p13, %p3509_p11 }
  0x65   : > { %p3507_p9 = pneg %p3506_p1 }
  0x66   : > { %p3513_p12 = por %p3512_p7, %p3511_p0 }
  0x68   : > { %p3514_p2 = pnand %p3513_p12, %p3507_p9 }
  0x6a   : > { %3517 = shalt.err (!%p3514_p2)
}
  0x6b   : > { %s3518_s3 = scalar_lea.vmem %s3820_s16, 4096  ;;  %s3609_s29 = smov [#allocation8]  }
  0x6c   : > { %p3519_p3 = scmp.ne.s32.totalorder %s3820_s16, %s3518_s3  ;;  %s3523_s23 = sshll.u32 %s3609_s29, 4  ;;  %s3524_s23 = int_to_ptr.vmem [resolvable:$false] %s3523_s23 }
  0x6d   : > { %s3525_s27 = scalar_lea.vmem %s3524_s23, 8192  ;;  %p3526_p4 = scmp.lt.s32.totalorder %s3820_s16, %s3524_s23 }
  0x6e   : > { %p3521_p5 = pnand %p3519_p3, %p3786_p10  ;;  %p3527_p1 = scmp.lt.s32.totalorder %s3525_s27, %s3518_s3 }
  0x70   : > { %p3522_p6 = pneg %p3521_p5  ;;  %p3528_p11 = por %p3527_p1, %p3526_p4 }
  0x72   : > { %p3529_p13 = pnand %p3528_p11, %p3522_p6 }
  0x74   : > { %3532 = shalt.err (!%p3529_p13)
}
  0x75   : > { %s3610_s24 = smov 64   ;;  %s3611_s2 = smov 4  }
  0x76   : > { %3215 = dma.hbm_to_vmem [thread:$0]  (!%p3762_p8), %s3815_s0, 4096, %s3820_s16, %s3780_s20, %s3610_s24, %s3610_s24, %s3611_s2  }
  0x77   : > { %p4420_p10 = scmp.ne.s32.totalorder %s4418_s15, 0 }
  0x78   : > { %s678_s28 = sand.u32 (!%p4420_p10), 1, %s3593_s30   ;;  %p4421_p9 = scmp.ne.s32.totalorder (!%p4420_p10), %s4411_s25, 0 }
  0x79   : > { %676 = sbr.rel (%p4420_p10) target bundleno = 3335 (0xd07), region = 92  ;;  %s679_s19 = scalar_lea.sflag (!%p4420_p10), [#allocation4], %s678_s28 }
  0x7a   : > { %s3194_s22 = smul.u32 (!%p4420_p10), 192, %s678_s28 }
  0x7c   : > { %s3885_s18 = scalar_lea.vmem (!%p4420_p10), [#allocation3], %s3194_s22 }
  0x80   : > { %3576 = dma.done.wait (%p4421_p9), %s679_s19, 3072  }
  0x81   : > { %3578 = vsyncadd (%p4421_p9), %s679_s19, 4294964224  ;;  %s687_s10 = sand.u32 1, %s3738_s1   ;;  %s2862_s26 = sshll.u32 %s678_s28, 8 }
  0x82   : > { %s688_s16 = scalar_lea.sflag [#allocation7], %s687_s10  ;;  %s3892_s20 = scalar_lea.vmem [#allocation6], %s2862_s26 }
  0x83   : > { %3580 = dma.done.wait (%p4421_p9), %s688_s16, 8192  }
  0x84   : > { %3582 = vsyncadd (%p4421_p9), %s688_s16, 4294959104  ;;  %p791_p8 = scmp.lt.s32.totalorder %s3738_s1, 1  ;;  %s4422_s6 = sld [smem:[#allocation22_spill]] }
  0x85   : > { %s4423_s5 = sld [smem:[#allocation21_spill]]  ;;  %s4424_s10 = sld [smem:[#allocation25_spill]] }
  0x86   : > { %s3900_s15 = scalar_select %p791_p8, %s3738_s1, 1 }
  0x87   : > { %s3944_s4 = scalar_lea.vmem [#allocation8], %s2862_s26  ;;  %p2867_p0 = scmp.ne.s32.totalorder %s3738_s1, 0 }
  0x88   : > { %s3195_s0 = smul.u32 3, %s3900_s15  ;;  %s2996_s21 = sshll.u32 %s3900_s15, 6 }
  0x89   : > { %s2866_s17 = sshll.u32 %s3900_s15, 2  ;;  %s815_s24 = scalar_lea.vmem %s4376_s13, %s3900_s15 }
  0x8a   : > { %s3907_s25 = scalar_lea.vmem %s4422_s6, %s2996_s21  ;;  %s3930_s6 = scalar_lea.vmem %s4374_s11, %s2866_s17 }
  0x8b   : > { %s3916_s28 = scalar_lea.vmem %s4423_s5, %s3195_s0  ;;  %s818_s27 = scalar_lea.vmem %s4377_s14, %s3900_s15 }
  0x8c   : > { %s821_s5 = scalar_lea.vmem %s4424_s10, %s3900_s15  ;;  %826 = sbr.rel (%p2867_p0) target bundleno = 320 (0x140), region = 108 }
  0x8d   : > { %s4425_s21 = sld [smem:[#allocation16_spill]] (!%p2867_p0)  ;;  %s4427_s10 = sld [smem:[#allocation18_spill]] (!%p2867_p0) }
  0x8e   : > { %s4428_s2 = sld [smem:[#allocation19_spill]] (!%p2867_p0) }
  0x93   : > { %s4426_s3 = smov %s4425_s21  ;;  %v827_v0 = vld [vmem:[%s4425_s21] sm:$0xff] }
  0x94   : > { %v828_v1 = vld [vmem:[%s4426_s3 + $0x8] sm:$0xff]  ;;  %831 = vadd.xlane.f32.xlu0 %v827_v0  ;;  %v838_v2 = vmul.f32 %v827_v0, %v827_v0  ;;  %v2868_v20 = vld [vmem:[%s4427_s10] ss:$0 sm:$0xff] }
  0x95   : > { %v839_v3 = vmul.f32 %v828_v1, %v828_v1  ;;  %v2869_v22 = vld [vmem:[%s4428_s2] ss:$0 sm:$0xff] }
  0x96   : > { %840 = vadd.xlane.f32.xlu1 %v838_v2 }
  0x98   : > { %833 = vadd.xlane.f32.xlu0 %v828_v1 }
  0x9a   : > { %842 = vadd.xlane.f32.xlu1 %v839_v3 }
 0x121   : > { %v832_v4 = vpop.xlane.xlu0 %831 }
 0x122   : > { %v836_v5 = vmul.f32 0.0078125, %v832_v4 }
 0x123   : > { %v841_v6 = vpop.xlane.xlu1 %840 }
 0x124   : > { %v846_v7 = vmul.f32 %v836_v5, %v836_v5  ;;  %v844_v8 = vmul.f32 0.0078125, %v841_v6  ;;  %v850_v18 = vsub.f32 %v827_v0, %v836_v5 }
 0x125   : > { %v834_v9 = vpop.xlane.xlu0 %833 }
 0x126   : > { %v848_v10 = vsub.f32 %v844_v8, %v846_v7  ;;  %v837_v11 = vmul.f32 0.0078125, %v834_v9 }
 0x127   : > { %v843_v12 = vpop.xlane.xlu1 %842 }
 0x128   : > { %v852_v13 = vadd.f32 1e-12, %v848_v10  ;;  %v847_v14 = vmul.f32 %v837_v11, %v837_v11  ;;  %v845_v15 = vmul.f32 0.0078125, %v843_v12  ;;  %v851_v24 = vsub.f32 %v828_v1, %v837_v11 }
 0x12a   : > { %3264 = vrsqrt.f32 %v852_v13  ;;  %v849_v16 = vsub.f32 %v845_v15, %v847_v14 }
 0x12c   : > { %v853_v17 = vadd.f32 1e-12, %v849_v16 }
 0x12e   : > { %3266 = vrsqrt.f32 %v853_v17 }
 0x134   : > { %v3265_v19 = vpop.eup %3264 }
 0x135   : > { %v856_v21 = vmul.f32 %v3265_v19, %v850_v18 }
 0x137   : > { %v864_v23 = vmul.f32 %v2868_v20, %v856_v21 }
 0x138   : > { %v3267_v25 = vpop.eup %3266 }
 0x139   : > { %v872_v26 = vadd.f32 %v2869_v22, %v864_v23  ;;  %v857_v27 = vmul.f32 %v3267_v25, %v851_v24 }
 0x13b   : > { %874 = vst [vmem:[#allocation2] sm:$0xff] %v872_v26  ;;  %v865_v28 = vmul.f32 %v2868_v20, %v857_v27 }
 0x13d   : > { %v873_v29 = vadd.f32 %v2869_v22, %v865_v28 }
 0x13f   : > { %875 = vst [vmem:[#allocation2 + $0x8] sm:$0xff] %v873_v29 }
 0x140 PF: > { %v3273_v30 = vld [vmem:[%s3885_s18 + $0x4] ss:$12 sps:$4 sm:$0xff]   ;;  %v3275_v31 = vld [vmem:[%s3885_s18] ss:$12 sps:$4 sm:$0xff]   ;;  %v3612_v32 = vmov 0   ;;  %v3613_v33 = vmov 0.0   ;;  %v915_v59 = vlaneseq  ;;  %s4430_s29 = scalar_lea.vmem %s4370_s7, %s3900_s15  ;;  %s4431_s26 = scalar_lea.vmem %s4371_s8, %s3900_s15 }
 0x141   : > { %1090 = vmatprep.mubr.bf16.mxu0 %v3612_v32  ;;  %3084 = vmatprep.subr.bf16.mxu1 %v3613_v33  ;;  %v3276_v34 = vld [vmem:[%s3885_s18 + $0x1c] ss:$12 sps:$4 sm:$0xff]   ;;  %v3278_v35 = vld [vmem:[%s3885_s18 + $0x18] ss:$12 sps:$4 sm:$0xff]   ;;  %v3279_v36 = vld [vmem:[%s3885_s18 + $0x34] ss:$12 sps:$4 sm:$0xff]   ;;  %s4432_s0 = scalar_lea.vmem %s4372_s9, %s3900_s15 }
 0x142   : > { %1058 = vmatprep.subr.bf16.mxu0 %v3273_v30  ;;  %v3281_v37 = vld [vmem:[%s3885_s18 + $0x30] ss:$12 sps:$4 sm:$0xff]   ;;  %v3282_v38 = vld [vmem:[%s3885_s18 + $0x4c] ss:$12 sps:$4 sm:$0xff]   ;;  %v3284_v39 = vld [vmem:[%s3885_s18 + $0x48] ss:$12 sps:$4 sm:$0xff]  }
 0x143   : > { %1059 = vmatpush1.bf16.msra.mxu0 %v3275_v31  ;;  %v3285_v40 = vld [vmem:[%s3885_s18 + $0x64] ss:$12 sps:$4 sm:$0xff]   ;;  %v3297_v41 = vld [vmem:[%s3885_s18 + $0x8] ss:$12 sps:$4 sm:$0xff]   ;;  %v3298_v42 = vld [vmem:[%s3885_s18 + $0x20] ss:$12 sps:$4 sm:$0xff]  }
 0x144   : > { %1060 = vmatprep.subr.bf16.mxu0 %v3276_v34  ;;  %3085 = vmatpush3.bf16.msra.mxu1 %v3297_v41  ;;  %v3287_v43 = vld [vmem:[%s3885_s18 + $0x60] ss:$12 sps:$4 sm:$0xff]   ;;  %v3288_v44 = vld [vmem:[%s3885_s18 + $0x7c] ss:$12 sps:$4 sm:$0xff]   ;;  %v3299_v45 = vld [vmem:[%s3885_s18 + $0x38] ss:$12 sps:$4 sm:$0xff]  }
 0x145   : > { %3086 = vmatprep.subr.bf16.mxu1 %v3613_v33  ;;  %v3290_v46 = vld [vmem:[%s3885_s18 + $0x78] ss:$12 sps:$4 sm:$0xff]   ;;  %v3291_v47 = vld [vmem:[%s3885_s18 + $0x94] ss:$12 sps:$4 sm:$0xff]   ;;  %v3300_v48 = vld [vmem:[%s3885_s18 + $0x50] ss:$12 sps:$4 sm:$0xff]  }
 0x146   : > { %v3293_v49 = vld [vmem:[%s3885_s18 + $0x90] ss:$12 sps:$4 sm:$0xff]   ;;  %v3294_v50 = vld [vmem:[%s3885_s18 + $0xac] ss:$12 sps:$4 sm:$0xff]   ;;  %v3301_v51 = vld [vmem:[%s3885_s18 + $0x68] ss:$12 sps:$4 sm:$0xff]  }
 0x147   : > { %1061 = vmatpush1.bf16.msra.mxu0 %v3278_v35  ;;  %v3296_v52 = vld [vmem:[%s3885_s18 + $0xa8] ss:$12 sps:$4 sm:$0xff]   ;;  %v3987_v54 = vld [vmem:[#allocation2 + $0x8] sm:$0xff]  ;;  %v3302_v55 = vld [vmem:[%s3885_s18 + $0x80] ss:$12 sps:$4 sm:$0xff]   ;;  %vm3614_vm0 = vmmov 0  }
 0x148   : > { %1062 = vmatprep.subr.bf16.mxu0 %v3279_v36  ;;  %3087 = vmatpush3.bf16.msra.mxu1 %v3298_v42  ;;  %v3985_v53 = vld [vmem:[#allocation2] sm:$0xff]  ;;  %v3303_v57 = vld [vmem:[%s3885_s18 + $0x98] ss:$12 sps:$4 sm:$0xff]   ;;  %v4006_v60 = vshrl.u32 %v915_v59, 7  ;;  %vm1148_vm1 = vcmask 523264   ;;  %vm1269_vm2 = vcmask 1043456  }
 0x149   : > { %3088 = vmatprep.subr.bf16.mxu1 %v3613_v33  ;;  %v880_v56 = vpack.c.bf16 %v3987_v54, %v3985_v53  ;;  %v3304_v58 = vld [vmem:[%s3885_s18 + $0xb0] ss:$12 sps:$4 sm:$0xff]   ;;  %3100 = vmatprep.mubr.msk.bf16.mxu1 %vm3614_vm0, %v3613_v33  ;;  %s4429_s22 = sld [smem:[#allocation17_spill]]  ;;  %vm1241_vm3 = vcmask 64512   ;;  %s3615_s17 = smov 64  }
 0x14a   : > { %v921_v61 = vsub.s32 1, %v4006_v60  ;;  %v913_v62 = vld [vmem:[%s3916_s28] sm:$0x7]  ;;  %v917_v0 = vsub.s32 0, %v4006_v60  ;;  %v925_v16 = vsub.s32 2, %v4006_v60  ;;  %p2980_p7 = scmp.ne.s32.totalorder %s3738_s1, 1 }
 0x14b   : > { %1063 = vmatpush1.bf16.msra.mxu0 %v3281_v37  ;;  %vm3617_vm4 = vmmov (!%p2980_p7), 0   ;;  %vm2561_vm5 = vcmask (!%p2980_p7), 1041409   ;;  %s4436_s21 = sld [smem:[#allocation27_spill]] (!%p2980_p7) }
 0x14c   : > { %1064 = vmatprep.subr.bf16.mxu0 %v3282_v38  ;;  %3089 = vmatpush3.bf16.msra.mxu1 %v3299_v45  ;;  %v922_v63 = vrot.slane %v913_v62, %v921_v61  ;;  %v918_v6 = vrot.slane %v913_v62, %v917_v0  ;;  %v926_v17 = vrot.slane %v913_v62, %v925_v16 }
 0x14d   : > { %3090 = vmatprep.subr.bf16.mxu1 %v3613_v33 }
 0x14f   : > { %1065 = vmatpush1.bf16.msra.mxu0 %v3284_v39  ;;  %v4036_v26 = vld [vmem:[%s4429_s22] sm:$0xff]  ;;  %v4043_v35 = vld [vmem:[%s4429_s22 + $0x8] sm:$0xff] }
 0x150   : > { %1066 = vmatprep.subr.bf16.mxu0 %v3285_v40  ;;  %3091 = vmatpush3.bf16.msra.mxu1 %v3300_v48 }
 0x151   : > { %3092 = vmatprep.subr.bf16.mxu1 %v3613_v33 }
 0x153   : > { %1067 = vmatpush1.bf16.msra.mxu0 %v3287_v43 }
 0x154   : > { %1068 = vmatprep.subr.bf16.mxu0 %v3288_v44  ;;  %3093 = vmatpush3.bf16.msra.mxu1 %v3301_v51 }
 0x155   : > { %3094 = vmatprep.subr.bf16.mxu1 %v3613_v33 }
 0x157   : > { %1069 = vmatpush1.bf16.msra.mxu0 %v3290_v46 }
 0x158   : > { %1070 = vmatprep.subr.bf16.mxu0 %v3291_v47  ;;  %3095 = vmatpush3.bf16.msra.mxu1 %v3302_v55 }
 0x159   : > { %3096 = vmatprep.subr.bf16.mxu1 %v3613_v33 }
 0x15b   : > { %1071 = vmatpush1.bf16.msra.mxu0 %v3293_v49 }
 0x15c   : > { %1072 = vmatprep.subr.bf16.mxu0 %v3294_v50  ;;  %3097 = vmatpush3.bf16.msra.mxu1 %v3303_v57 }
 0x15d   : > { %3098 = vmatprep.subr.bf16.mxu1 %v3613_v33 }
 0x15f   : > { %1073 = vmatpush1.bf16.msra.mxu0 %v3296_v52 }
 0x160   : > { %3128 = vmatprep.subr.bf16.mxu0 %v3613_v33  ;;  %3099 = vmatpush3.bf16.msra.mxu1 %v3304_v58 }
 0x161   : > { %3104 = vmatprep.subr.bf16.mxu1 %v3613_v33 }
 0x162   : > { %1091 = vmatmul.mubr.bf16.vlgmr.msra.gmra.mrb[0].mxu0 %v880_v56 }
 0x163   : > { %3130 = vmatprep.mubr.msk.bf16.mxu0 %vm3614_vm0, %v3613_v33  ;;  %3101 = vmatmul.mubr.bf16.vlgmr.msra.gmra.mrb[0].mxu1 %v880_v56 }
 0x164   : > { %3106 = vmatprep.mubr.msk.bf16.mxu1 %vm3614_vm0, %v3613_v33 }
 0x235   : > { %v1092_v1 = vpop.f32.mrb[0].mxu0 }
 0x236   : > { %v1094_v2 = vpop.f32.mrb[1].mxu0  ;;  %v1093_v10 = vadd.f32 %v1092_v1, %v918_v6  ;;  %v1135_v18 = vpop.f32.mrb[0].mxu1 }
 0x237   : > { %v1095_v3 = vadd.f32 %v1094_v2, %v922_v63  ;;  %v1096_v4 = vpop.f32.mrb[2].mxu0  ;;  %v1136_v19 = vadd.f32 %v1135_v18, %v926_v17  ;;  %v3102_v20 = vpop.f32.mrb[1].mxu1 }
 0x238   : > { %v1098_v5 = vpop.f32.mrb[3].mxu0  ;;  %v1142_v12 = vpack.c.bf16 %v1093_v10, %v1093_v10  ;;  %v1097_v14 = vadd.f32 %v1096_v4, %v918_v6  ;;  %v1138_v21 = vpop.f32.mrb[2].mxu1 }
 0x239   : > { %v1143_v7 = vpack.c.bf16 %v1095_v3, %v1095_v3  ;;  %v1099_v9 = vadd.f32 %v1098_v5, %v922_v63  ;;  %v4028_v22 = vpack.c.bf16 %v1136_v19, %v1136_v19  ;;  %v1139_v23 = vadd.f32 %v1138_v21, %v926_v17  ;;  %v3103_v24 = vpop.f32.mrb[3].mxu1 }
 0x23a   : > { %v1145_v15 = vpack.c.bf16 %v1097_v14, %v1097_v14 }
 0x23b   : > { %v1153_v8 = vsel %vm1148_vm1, %v1143_v7, 0  ;;  %v1146_v11 = vpack.c.bf16 %v1099_v9, %v1099_v9  ;;  %v1271_v25 = vsel %vm1269_vm2, %v4028_v22, 0  ;;  %v1147_v58 = vpack.c.bf16 %v1139_v23, %v1139_v23 }
 0x23c   : > { %3105 = vmatpush3.bf16.xpose.msra.mxu1 %v1153_v8 }
 0x23d   : > { %3110 = vmatprep.subr.bf16.mxu1 %v3613_v33  ;;  %v1199_v13 = vsel %vm1148_vm1, %v1146_v11, 0  ;;  %v1317_v63 = vsel %vm1269_vm2, %v1147_v58, 0 }
 0x243   : > { %3107 = vmatmul.mubr.msk.bf16.vlgmr.msra.gmra.mrb[4].mxu1 %vm1148_vm1, %v1142_v12 }
 0x244   : > { %3111 = vmatpush3.bf16.xpose.msra.mxu1 %v1199_v13  ;;  %3112 = vmatprep.mubr.msk.bf16.mxu1 %vm3614_vm0, %v3613_v33 }
 0x245   : > { %3116 = vmatprep.subr.bf16.mxu1 %v3613_v33 }
 0x24b   : > { %3113 = vmatmul.mubr.msk.bf16.vlgmr.msra.gmra.mrb[8].mxu1 %vm1148_vm1, %v1145_v15 }
 0x24c   : > { %3118 = vmatprep.mubr.msk.bf16.mxu1 %vm3614_vm0, %v3613_v33  ;;  %3117 = vmatpush3.bf16.msra.mxu1 %v1271_v25 }
 0x24d   : > { %3122 = vmatprep.subr.bf16.mxu1 %v3613_v33 }
 0x316   : > { %v1189_v27 = vpop.f32.mrb[4].mxu1 }
 0x317   : > { %v1190_v28 = vadd.f32 %v1189_v27, %v4036_v26  ;;  %v3108_v29 = vpop.f32.mrb[5].mxu1 }
 0x318   : > { %v1192_v30 = vpop.f32.mrb[6].mxu1 }
 0x319   : > { %v3109_v31 = vpop.f32.mrb[7].mxu1  ;;  %v1242_v34 = vsel %vm1241_vm3, %v1190_v28, -inf }
 0x31a   : > { %1243 = vmax.xlane.f32.xlu0 %v1242_v34 }
 0x31e   : > { %v1235_v36 = vpop.f32.mrb[8].mxu1 }
 0x31f   : > { %v1236_v37 = vadd.f32 %v1235_v36, %v4043_v35  ;;  %v3114_v38 = vpop.f32.mrb[9].mxu1 }
 0x320   : > { %v1238_v39 = vpop.f32.mrb[10].mxu1 }
 0x321   : > { %v3115_v40 = vpop.f32.mrb[11].mxu1  ;;  %v1245_v41 = vsel %vm1241_vm3, %v1236_v37, -inf }
 0x322   : > { %1246 = vmax.xlane.f32.xlu0 %v1245_v41 }
 0x338   : > { %1363 = vrot.lane.b32.xlu0 %v1143_v7, %s3615_s17 }
 0x3a7   : > { %v1244_v42 = vpop.xlane.xlu0 %1243 }
 0x3a8   : > { %v1248_v43 = vsub.f32 %v1190_v28, %v1244_v42 }
 0x3aa   : > { %v1250_v44 = vmul.f32 1.442695, %v1248_v43 }
 0x3ac   : > { %3393 = vpow2.f32 %v1250_v44 }
 0x3af   : > { %v1247_v45 = vpop.xlane.xlu0 %1246 }
 0x3b0   : > { %v1249_v50 = vsub.f32 %v1236_v37, %v1247_v45 }
 0x3b2   : > { %v1252_v51 = vmul.f32 1.442695, %v1249_v50 }
 0x3b3   : > { %v1364_v46 = vpop.permute.xlu0 %1363 }
 0x3b4   : > { %v1369_v47 = vsel %vm1148_vm1, %v1364_v46, 0  ;;  %3395 = vpow2.f32 %v1252_v51 }
 0x3b5   : > { %3129 = vmatpush3.bf16.xpose.msra.mxu0 %v1369_v47 }
 0x3b6   : > { %v3394_v48 = vpop.eup %3393  ;;  %3140 = vmatprep.subr.bf16.mxu0 %v3613_v33 }
 0x3b7   : > { %v1254_v49 = vsel %vm1241_vm3, %v3394_v48, 0.0 }
 0x3b8   : > { %1255 = vadd.xlane.f32.xlu1 %v1254_v49 }
 0x3be   : > { %v3396_v52 = vpop.eup %3395 }
 0x3bf   : > { %v1257_v55 = vsel %vm1241_vm3, %v3396_v52, 0.0 }
 0x3c9   : > { %1415 = vrot.lane.b32.xlu1 %v1146_v11, %s3615_s17 }
 0x3ed   : > { %1258 = vadd.xlane.f32.xlu1 %v1257_v55 }
 0x3fe   : > { %1360 = vrot.lane.b32.xlu1 %v1142_v12, %s3615_s17 }
 0x402   : > { %1412 = vrot.lane.b32.xlu1 %v1145_v15, %s3615_s17 }
 0x445   : > { %v1256_v56 = vpop.xlane.xlu1 %1255 }
 0x446   : > { %3397 = vrcp.f32 %v1256_v56  ;;  %v3305_v56 = vld [vmem:[%s3907_s25] sm:$0xff]  }
 0x449   : > { %v1416_v1 = vpop.permute.xlu1 %1415 }
 0x44a   : > { %v1421_v7 = vsel %vm1148_vm1, %v1416_v1, 0  ;;  %v3311_v1 = vld [vmem:[%s3907_s25 + $0x30] sm:$0xff]  }
 0x450   : > { %v3398_v57 = vpop.eup %3397 }
 0x451   : > { %v1262_v59 = vmul.f32 %v3398_v57, %v3394_v48  ;;  %v3306_v57 = vld [vmem:[%s3907_s25 + $0x8] sm:$0xff]  }
 0x453   : > { %v1264_v62 = vpack.c.bf16 %v1262_v59, %v1262_v59  ;;  %v3308_v59 = vld [vmem:[%s3907_s25 + $0x18] sm:$0xff]  }
 0x455   : > { %3119 = vmatmul.mubr.msk.bf16.vlgmr.msra.gmra.mrb[12].mxu1 %vm1241_vm3, %v1264_v62  ;;  %v3309_v62 = vld [vmem:[%s3907_s25 + $0x20] sm:$0xff]  }
 0x456   : > { %3123 = vmatpush3.bf16.msra.mxu1 %v1317_v63  ;;  %3124 = vmatprep.mubr.msk.bf16.mxu1 %vm3614_vm0, %v3613_v33  ;;  %v3310_v63 = vld [vmem:[%s3907_s25 + $0x28] sm:$0xff]  }
 0x457   : > { %3134 = vmatprep.subr.bf16.mxu1 %v3613_v33 }
 0x47a   : > { %v1259_v2 = vpop.xlane.xlu1 %1258 }
 0x47b   : > { %3399 = vrcp.f32 %v1259_v2  ;;  %v3312_v2 = vld [vmem:[%s3907_s25 + $0x38] sm:$0xff]  }
 0x47e   : > { %v1361_v3 = vpop.permute.xlu1 %1360 }
 0x47f   : > { %3131 = vmatmul.mubr.msk.bf16.vlgmr.msra.gmra.mrb[4].mxu0 %vm1148_vm1, %v1361_v3 }
 0x480   : > { %3142 = vmatprep.mubr.msk.bf16.mxu0 %vm3614_vm0, %v3613_v33 }
 0x482   : > { %v1413_v8 = vpop.permute.xlu1 %1412 }
 0x485   : > { %v3400_v4 = vpop.eup %3399 }
 0x486   : > { %v1263_v5 = vmul.f32 %v3400_v4, %v3396_v52 }
 0x488   : > { %v1265_v6 = vpack.c.bf16 %v1263_v5, %v1263_v5 }
 0x48a   : > { %3125 = vmatmul.mubr.msk.bf16.vlgmr.msra.gmra.mrb[16].mxu1 %vm1241_vm3, %v1265_v6 }
 0x48b   : > { %3135 = vmatpush3.bf16.xpose.msra.mxu1 %v1421_v7  ;;  %3136 = vmatprep.mubr.msk.bf16.mxu1 %vm3614_vm0, %v3613_v33 }
 0x48c   : > { %3146 = vmatprep.subr.bf16.mxu1 %v3613_v33 }
 0x492   : > { %3137 = vmatmul.mubr.msk.bf16.vlgmr.msra.gmra.mrb[20].mxu1 %vm1148_vm1, %v1413_v8 }
 0x493   : > { %3148 = vmatprep.mubr.msk.bf16.mxu1 %vm3614_vm0, %v3613_v33 }
 0x528   : > { %v4071_v9 = vpop.f32.mrb[12].mxu1 }
 0x529   : > { %v3120_v10 = vpop.f32.mrb[13].mxu1 }
 0x52a   : > { %v1310_v11 = vpop.f32.mrb[14].mxu1 }
 0x52b   : > { %v3121_v12 = vpop.f32.mrb[15].mxu1 }
 0x552   : > { %v1405_v13 = vpop.f32.mrb[4].mxu0 }
 0x553   : > { %v1406_v14 = vadd.f32 %v1405_v13, %v4036_v26  ;;  %v3132_v15 = vpop.f32.mrb[5].mxu0 }
 0x554   : > { %v1408_v17 = vpop.f32.mrb[6].mxu0 }
 0x555   : > { %v3133_v18 = vpop.f32.mrb[7].mxu0  ;;  %v1463_v19 = vsel %vm1241_vm3, %v1406_v14, -inf }
 0x556   : > { %1464 = vmax.xlane.f32.xlu0 %v1463_v19  ;;  %v2902_v19 = vld [vmem:[%s4430_s29] ss:$0 sm:$0xff]  ;;  %s4435_s29 = sld [smem:[#allocation26_spill]] (!%p2980_p7) }
 0x55d   : > { %v4075_v20 = vpop.f32.mrb[16].mxu1 }
 0x55e   : > { %v3126_v21 = vpop.f32.mrb[17].mxu1 }
 0x55f   : > { %v1356_v23 = vpop.f32.mrb[18].mxu1 }
 0x560   : > { %v3127_v24 = vpop.f32.mrb[19].mxu1 }
 0x565   : > { %v1457_v25 = vpop.f32.mrb[20].mxu1 }
 0x566   : > { %v1458_v27 = vadd.f32 %v1457_v25, %v4043_v35  ;;  %v3138_v28 = vpop.f32.mrb[21].mxu1 }
 0x567   : > { %v1460_v29 = vpop.f32.mrb[22].mxu1 }
 0x568   : > { %v3139_v30 = vpop.f32.mrb[23].mxu1  ;;  %v1466_v31 = vsel %vm1241_vm3, %v1458_v27, -inf  ;;  %v3315_v29 = vld [vmem:[%s3892_s20 + $0x4] ss:$16 sps:$4 sm:$0xff]  }
 0x569   : > { %1467 = vmax.xlane.f32.xlu1 %v1466_v31  ;;  %v3318_v30 = vld [vmem:[%s3892_s20 + $0xc] ss:$16 sps:$4 sm:$0xff]   ;;  %v3316_v31 = vld [vmem:[%s3892_s20 + $0x8] ss:$16 sps:$4 sm:$0xff]  }
 0x57a   : > { %1537 = vrot.lane.b32.xlu1 %v1147_v58, %s3615_s17  ;;  %v3307_v58 = vld [vmem:[%s3907_s25 + $0x10] sm:$0xff]  }
 0x5e3   : > { %v1465_v26 = vpop.xlane.xlu0 %1464 }
 0x5e4   : > { %v1469_v34 = vsub.f32 %v1406_v14, %v1465_v26  ;;  %v3321_v26 = vld [vmem:[%s3892_s20 + $0x24] ss:$16 sps:$4 sm:$0xff]  }
 0x5e6   : > { %v1471_v36 = vmul.f32 1.442695, %v1469_v34  ;;  %v3324_v34 = vld [vmem:[%s3892_s20 + $0x2c] ss:$16 sps:$4 sm:$0xff]  }
 0x5e8   : > { %3401 = vpow2.f32 %v1471_v36  ;;  %v3319_v36 = vld [vmem:[%s3892_s20 + $0x20] ss:$16 sps:$4 sm:$0xff]  }
 0x5f2   : > { %v3402_v37 = vpop.eup %3401 }
 0x5f3   : > { %v1475_v38 = vsel %vm1241_vm3, %v3402_v37, 0.0 }
 0x5f4   : > { %1476 = vadd.xlane.f32.xlu0 %v1475_v38  ;;  %v3327_v38 = vld [vmem:[%s3892_s20 + $0x44] ss:$16 sps:$4 sm:$0xff]  }
 0x5f6   : > { %v1468_v39 = vpop.xlane.xlu1 %1467 }
 0x5f7   : > { %v1470_v40 = vsub.f32 %v1458_v27, %v1468_v39  ;;  %v3330_v39 = vld [vmem:[%s3892_s20 + $0x4c] ss:$16 sps:$4 sm:$0xff]  }
 0x5f9   : > { %v1473_v41 = vmul.f32 1.442695, %v1470_v40  ;;  %v3325_v40 = vld [vmem:[%s3892_s20 + $0x40] ss:$16 sps:$4 sm:$0xff]  }
 0x5fa   : > { %v1538_v35 = vpop.permute.xlu1 %1537 }
 0x5fb   : > { %3403 = vpow2.f32 %v1473_v41  ;;  %v1543_v42 = vsel %vm1269_vm2, %v1538_v35, 0  ;;  %v3328_v41 = vld [vmem:[%s3892_s20 + $0x48] ss:$16 sps:$4 sm:$0xff]   ;;  %v3333_v35 = vld [vmem:[%s3892_s20 + $0x64] ss:$16 sps:$4 sm:$0xff]  }
 0x5fc   : > { %3147 = vmatpush3.bf16.msra.mxu1 %v1543_v42  ;;  %v3336_v42 = vld [vmem:[%s3892_s20 + $0x6c] ss:$16 sps:$4 sm:$0xff]  }
 0x5fd   : > { %1970 = vmatprep.subr.bf16.mxu1 %v3315_v29  ;;  %v3362_v29 = vld [vmem:[%s3944_s4 + $0xc0] sm:$0xff]  }
 0x605   : > { %v3404_v43 = vpop.eup %3403 }
 0x606   : > { %v1478_v44 = vsel %vm1241_vm3, %v3404_v43, 0.0 }
 0x607   : > { %1479 = vadd.xlane.f32.xlu0 %v1478_v44  ;;  %v3334_v44 = vld [vmem:[%s3892_s20 + $0x68] ss:$16 sps:$4 sm:$0xff]  }
 0x61d   : > { %1488 = vrot.lane.b32.xlu0 %v4028_v22, %s3615_s17 }
 0x681   : > { %v1477_v45 = vpop.xlane.xlu0 %1476 }
 0x682   : > { %3405 = vrcp.f32 %v1477_v45  ;;  %v3339_v45 = vld [vmem:[%s3892_s20 + $0x84] ss:$16 sps:$4 sm:$0xff]  }
 0x68c   : > { %v3406_v46 = vpop.eup %3405 }
 0x68d   : > { %v1483_v48 = vmul.f32 %v3406_v46, %v3402_v37  ;;  %v3322_v37 = vld [vmem:[%s3892_s20 + $0x28] ss:$16 sps:$4 sm:$0xff]   ;;  %v3337_v46 = vld [vmem:[%s3892_s20 + $0x80] ss:$16 sps:$4 sm:$0xff]  }
 0x68f   : > { %v1485_v51 = vpack.c.bf16 %v1483_v48, %v1483_v48  ;;  %v3342_v48 = vld [vmem:[%s3892_s20 + $0x8c] ss:$16 sps:$4 sm:$0xff]  }
 0x694   : > { %v1480_v47 = vpop.xlane.xlu0 %1479 }
 0x695   : > { %3407 = vrcp.f32 %v1480_v47  ;;  %v3340_v47 = vld [vmem:[%s3892_s20 + $0x88] ss:$16 sps:$4 sm:$0xff]  }
 0x698   : > { %v1489_v49 = vpop.permute.xlu0 %1488 }
 0x699   : > { %v1494_v50 = vsel %vm1269_vm2, %v1489_v49, 0  ;;  %v3345_v49 = vld [vmem:[%s3892_s20 + $0xa4] ss:$16 sps:$4 sm:$0xff]  }
 0x69a   : > { %3141 = vmatpush3.bf16.msra.mxu0 %v1494_v50  ;;  %v3348_v50 = vld [vmem:[%s3892_s20 + $0xac] ss:$16 sps:$4 sm:$0xff]  }
 0x69b   : > { %3152 = vmatprep.subr.bf16.mxu0 %v3613_v33 }
 0x69d   : > { %3143 = vmatmul.mubr.msk.bf16.vlgmr.msra.gmra.mrb[8].mxu0 %vm1241_vm3, %v1485_v51  ;;  %v3343_v51 = vld [vmem:[%s3892_s20 + $0xa0] ss:$16 sps:$4 sm:$0xff]  }
 0x69e   : > { %3168 = vmatprep.mubr.msk.bf16.mxu0 %vm3614_vm0, %v3613_v33  ;;  %3153 = vmatpush3.bf16.msra.mxu0 %v3305_v56  ;;  %v3349_v56 = vld [vmem:[%s3892_s20 + $0xc0] ss:$16 sps:$4 sm:$0xff]  }
 0x69f   : > { %v3408_v22 = vpop.eup %3407  ;;  %3154 = vmatprep.subr.bf16.mxu0 %v3613_v33 }
 0x6a0   : > { %v1484_v52 = vmul.f32 %v3408_v22, %v3404_v43  ;;  %v3331_v43 = vld [vmem:[%s3892_s20 + $0x60] ss:$16 sps:$4 sm:$0xff]   ;;  %v3346_v22 = vld [vmem:[%s3892_s20 + $0xa8] ss:$16 sps:$4 sm:$0xff]  }
 0x6a2   : > { %v1486_v55 = vpack.c.bf16 %v1484_v52, %v1484_v52  ;;  %3155 = vmatpush3.bf16.msra.mxu0 %v3306_v57  ;;  %v3351_v52 = vld [vmem:[%s3892_s20 + $0xc4] ss:$16 sps:$4 sm:$0xff]   ;;  %v3352_v57 = vld [vmem:[%s3892_s20 + $0xc8] ss:$16 sps:$4 sm:$0xff]  }
 0x6a3   : > { %3156 = vmatprep.subr.bf16.mxu0 %v3613_v33 }
 0x6a4   : > { %3149 = vmatmul.mubr.msk.bf16.vlgmr.msra.gmra.mrb[24].mxu1 %vm1241_vm3, %v1486_v55  ;;  %v3354_v55 = vld [vmem:[%s3892_s20 + $0xcc] ss:$16 sps:$4 sm:$0xff]  }
 0x6a5   : > { %2002 = vmatprep.mubr.bf16.mxu1 %v3612_v32 }
 0x6a6   : > { %3157 = vmatpush3.bf16.msra.mxu0 %v3307_v58  ;;  %v3357_v58 = vld [vmem:[%s3892_s20 + $0xe4] ss:$16 sps:$4 sm:$0xff]  }
 0x6a7   : > { %3158 = vmatprep.subr.bf16.mxu0 %v3613_v33 }
 0x6aa   : > { %3159 = vmatpush3.bf16.msra.mxu0 %v3308_v59  ;;  %v3360_v59 = vld [vmem:[%s3892_s20 + $0xec] ss:$16 sps:$4 sm:$0xff]  }
 0x6ab   : > { %3160 = vmatprep.subr.bf16.mxu0 %v3613_v33 }
 0x6ae   : > { %3161 = vmatpush3.bf16.msra.mxu0 %v3309_v62  ;;  %v3355_v62 = vld [vmem:[%s3892_s20 + $0xe0] ss:$16 sps:$4 sm:$0xff]  }
 0x6af   : > { %3162 = vmatprep.subr.bf16.mxu0 %v3613_v33 }
 0x6b2   : > { %3163 = vmatpush3.bf16.msra.mxu0 %v3310_v63  ;;  %v3358_v63 = vld [vmem:[%s3892_s20 + $0xe8] ss:$16 sps:$4 sm:$0xff]  }
 0x6b3   : > { %3164 = vmatprep.subr.bf16.mxu0 %v3613_v33 }
 0x6b6   : > { %3165 = vmatpush3.bf16.msra.mxu0 %v3311_v1 }
 0x6b7   : > { %3166 = vmatprep.subr.bf16.mxu0 %v3613_v33 }
 0x6ba   : > { %3167 = vmatpush3.bf16.msra.mxu0 %v3312_v2 }
 0x6bb   : > { %2013 = vmatprep.subr.bf16.mxu0 %v3318_v30  ;;  %v3363_v30 = vld [vmem:[%s3944_s4] sm:$0xff]  }
 0x770   : > { %v1530_v3 = vpop.f32.mrb[8].mxu0 }
 0x771   : > { %v3144_v4 = vpop.f32.mrb[9].mxu0 }
 0x772   : > { %v1533_v5 = vpop.f32.mrb[10].mxu0 }
 0x773   : > { %v3145_v6 = vpop.f32.mrb[11].mxu0 }
 0x777   : > { %v1579_v7 = vpop.f32.mrb[24].mxu1 }
 0x778   : > { %v3268_v8 = vpack.i.bf16 %v1579_v7, %v1530_v3  ;;  %v3150_v10 = vpop.f32.mrb[25].mxu1 }
 0x779   : > { %v1582_v11 = vpop.f32.mrb[26].mxu1 }
 0x77a   : > { %3269 = vrot.lane.b32.xlu1 %v3268_v8, %s3615_s17  ;;  %v3151_v12 = vpop.f32.mrb[27].mxu1  ;;  %s4434_s17 = sld [smem:[#allocation28_spill]] (!%p2980_p7) }
 0x7ec   : > { %v3270_v13 = vpop.permute.xlu1 %3269 }
 0x7ed   : > { %v3272_v14 = vunpack.i.h.bf16 %v3270_v13  ;;  %v3271_v15 = vunpack.i.l.bf16 %v3270_v13 }
 0x7ef   : > { %v1594_v33 = vsel %vm1148_vm1, %v4075_v20, %v3272_v14  ;;  %v1593_v17 = vsel %vm1148_vm1, %v4071_v9, %v3271_v15 }
 0x7f0   : > { %v1595_v18 = vpack.c.bf16 %v1594_v33, %v1593_v17 }
 0x7f2   : > { %3169 = vmatmul.mubr.bf16.vlgmr.msra.gmra.mrb[12].mxu0 %v1595_v18 }
 0x7f3   : > { %2045 = vmatprep.mubr.bf16.mxu0 %v3612_v32  ;;  %2014 = vmatpush1.bf16.msra.mxu0 %v3316_v31  ;;  %v3365_v31 = vld [vmem:[%s3944_s4 + $0x48] sm:$0xff]  }
 0x7f4   : > { %2015 = vmatprep.subr.bf16.mxu0 %v3324_v34  ;;  %v3367_v34 = vld [vmem:[%s3944_s4 + $0x8] sm:$0xff]  }
 0x7f7   : > { %2016 = vmatpush1.bf16.msra.mxu0 %v3322_v37  ;;  %v3369_v37 = vld [vmem:[%s3944_s4 + $0x50] sm:$0xff]  }
 0x7f8   : > { %2017 = vmatprep.subr.bf16.mxu0 %v3330_v39  ;;  %v3371_v39 = vld [vmem:[%s3944_s4 + $0x10] sm:$0xff]  }
 0x7fb   : > { %2018 = vmatpush1.bf16.msra.mxu0 %v3328_v41  ;;  %v3373_v41 = vld [vmem:[%s3944_s4 + $0x58] sm:$0xff]  }
 0x7fc   : > { %2019 = vmatprep.subr.bf16.mxu0 %v3336_v42  ;;  %v3375_v42 = vld [vmem:[%s3944_s4 + $0x18] sm:$0xff]  }
 0x7ff   : > { %2020 = vmatpush1.bf16.msra.mxu0 %v3334_v44  ;;  %v3377_v44 = vld [vmem:[%s3944_s4 + $0x60] sm:$0xff]  }
 0x800   : > { %2021 = vmatprep.subr.bf16.mxu0 %v3342_v48  ;;  %v3381_v48 = vld [vmem:[%s3944_s4 + $0x68] sm:$0xff]  }
 0x803   : > { %2022 = vmatpush1.bf16.msra.mxu0 %v3340_v47  ;;  %v3380_v47 = vld [vmem:[%s3944_s4 + $0xa0] sm:$0xff]  }
 0x804   : > { %2023 = vmatprep.subr.bf16.mxu0 %v3348_v50  ;;  %v3383_v50 = vld [vmem:[%s3944_s4 + $0x28] sm:$0xff]  }
 0x807   : > { %2024 = vmatpush1.bf16.msra.mxu0 %v3346_v22  ;;  %v3385_v22 = vld [vmem:[%s3944_s4 + $0x70] sm:$0xff]  }
 0x808   : > { %2025 = vmatprep.subr.bf16.mxu0 %v3354_v55  ;;  %v3387_v55 = vld [vmem:[%s3944_s4 + $0x30] sm:$0xff]  }
 0x80b   : > { %2026 = vmatpush1.bf16.msra.mxu0 %v3352_v57  ;;  %v3389_v57 = vld [vmem:[%s3944_s4 + $0x78] sm:$0xff]  }
 0x80c   : > { %2027 = vmatprep.subr.bf16.mxu0 %v3360_v59  ;;  %v3391_v59 = vld [vmem:[%s3944_s4 + $0x38] sm:$0xff]  }
 0x80f   : > { %2028 = vmatpush1.bf16.msra.mxu0 %v3358_v63  ;;  %v1788_v63 = vld [vmem:[%s3930_s6] sm:$0xf] }
 0x810   : > { %3053 = vmatprep.subr.bf16.mxu0 %v3362_v29 }
 0x8c5   : > { %v1701_v21 = vpop.f32.mrb[12].mxu0 }
 0x8c6   : > { %v1702_v23 = vadd.f32 %v2902_v19, %v1701_v21  ;;  %v3170_v24 = vpop.f32.mrb[13].mxu0 }
 0x8c7   : > { %v1704_v20 = vpop.f32.mrb[14].mxu0 }
 0x8c8   : > { %v4119_v25 = vadd.f32 %v1702_v23, %v3985_v53  ;;  %v1705_v9 = vadd.f32 %v2902_v19, %v1704_v20  ;;  %v3171_v27 = vpop.f32.mrb[15].mxu0  ;;  %v2911_v19 = vld [vmem:[%s4431_s26] ss:$0 sm:$0xff] }
 0x8ca   : > { %v4122_v32 = vadd.f32 %v1705_v9, %v3987_v54  ;;  %1712 = vadd.xlane.f32.xlu1 %v4119_v25  ;;  %v1719_v28 = vmul.f32 %v4119_v25, %v4119_v25  ;;  %v3313_v54 = vld [vmem:[%s3892_s20] ss:$16 sps:$4 sm:$0xff]  }
 0x8cb   : > { %1971 = vmatpush1.bf16.msra.mxu1 %v3313_v54  ;;  %v3364_v54 = vld [vmem:[%s3944_s4 + $0x80] sm:$0xff]  }
 0x8cc   : > { %1714 = vadd.xlane.f32.xlu0 %v4122_v32  ;;  %v1720_v53 = vmul.f32 %v4122_v32, %v4122_v32  ;;  %1972 = vmatprep.subr.bf16.mxu1 %v3321_v26  ;;  %v3366_v26 = vld [vmem:[%s3944_s4 + $0xc8] sm:$0xff]  }
 0x8cf   : > { %1973 = vmatpush1.bf16.msra.mxu1 %v3319_v36  ;;  %v3368_v36 = vld [vmem:[%s3944_s4 + $0x88] sm:$0xff]  }
 0x8d0   : > { %1721 = vadd.xlane.f32.xlu0 %v1719_v28  ;;  %1974 = vmatprep.subr.bf16.mxu1 %v3327_v38  ;;  %v3370_v38 = vld [vmem:[%s3944_s4 + $0xd0] sm:$0xff]  }
 0x8d3   : > { %1975 = vmatpush1.bf16.msra.mxu1 %v3325_v40  ;;  %v3372_v40 = vld [vmem:[%s3944_s4 + $0x90] sm:$0xff]  }
 0x8d4   : > { %1723 = vadd.xlane.f32.xlu0 %v1720_v53  ;;  %1976 = vmatprep.subr.bf16.mxu1 %v3333_v35  ;;  %v3361_v53 = vld [vmem:[%s3944_s4 + $0x40] sm:$0xff]   ;;  %v3374_v35 = vld [vmem:[%s3944_s4 + $0xd8] sm:$0xff]  }
 0x8d7   : > { %1977 = vmatpush1.bf16.msra.mxu1 %v3331_v43  ;;  %v3376_v43 = vld [vmem:[%s3944_s4 + $0x98] sm:$0xff]  }
 0x8d8   : > { %1978 = vmatprep.subr.bf16.mxu1 %v3339_v45  ;;  %v3378_v45 = vld [vmem:[%s3944_s4 + $0xe0] sm:$0xff]  }
 0x8db   : > { %1979 = vmatpush1.bf16.msra.mxu1 %v3337_v46  ;;  %v3379_v46 = vld [vmem:[%s3944_s4 + $0x20] sm:$0xff]  }
 0x8dc   : > { %1980 = vmatprep.subr.bf16.mxu1 %v3345_v49  ;;  %v3382_v49 = vld [vmem:[%s3944_s4 + $0xe8] sm:$0xff]  }
 0x8df   : > { %1981 = vmatpush1.bf16.msra.mxu1 %v3343_v51  ;;  %v3384_v51 = vld [vmem:[%s3944_s4 + $0xa8] sm:$0xff]  }
 0x8e0   : > { %1982 = vmatprep.subr.bf16.mxu1 %v3351_v52  ;;  %v3386_v52 = vld [vmem:[%s3944_s4 + $0xf0] sm:$0xff]  }
 0x8e3   : > { %1983 = vmatpush1.bf16.msra.mxu1 %v3349_v56  ;;  %v3388_v56 = vld [vmem:[%s3944_s4 + $0xb0] sm:$0xff]  }
 0x8e4   : > { %1984 = vmatprep.subr.bf16.mxu1 %v3357_v58  ;;  %v3390_v58 = vld [vmem:[%s3944_s4 + $0xf8] sm:$0xff]  }
 0x8e7   : > { %1985 = vmatpush1.bf16.msra.mxu1 %v3355_v62  ;;  %v3392_v62 = vld [vmem:[%s3944_s4 + $0xb8] sm:$0xff]  }
 0x8e8   : > { %3031 = vmatprep.subr.bf16.mxu1 %v3361_v53 }
 0x957   : > { %v1713_v1 = vpop.xlane.xlu1 %1712 }
 0x958   : > { %v1717_v3 = vmul.f32 0.0078125, %v1713_v1  ;;  %v1804_v1 = vsub.s32 3, %v4006_v60 }
 0x959   : > { %v1715_v2 = vpop.xlane.xlu0 %1714 }
 0x95a   : > { %v1727_v5 = vmul.f32 %v1717_v3, %v1717_v3  ;;  %v1718_v6 = vmul.f32 0.0078125, %v1715_v2  ;;  %v1731_v33 = vsub.f32 %v4119_v25, %v1717_v3  ;;  %v2912_v25 = vld [vmem:[%s4432_s0] ss:$0 sm:$0xff]  ;;  %v1793_v2 = vrot.slane %v1788_v63, %v917_v0 }
 0x95b   : > { %v1801_v3 = vrot.slane %v1788_v63, %v925_v16 }
 0x95c   : > { %v1728_v11 = vmul.f32 %v1718_v6, %v1718_v6  ;;  %v1732_v21 = vsub.f32 %v4122_v32, %v1718_v6 }
 0x95d   : > { %v1722_v4 = vpop.xlane.xlu0 %1721 }
 0x95e   : > { %v1725_v7 = vmul.f32 0.0078125, %v1722_v4  ;;  %v1797_v4 = vrot.slane %v1788_v63, %v921_v61 }
 0x960   : > { %v1729_v8 = vsub.f32 %v1725_v7, %v1727_v5  ;;  %v1805_v5 = vrot.slane %v1788_v63, %v1804_v1 }
 0x961   : > { %v1724_v10 = vpop.xlane.xlu0 %1723 }
 0x962   : > { %v1733_v12 = vadd.f32 1e-12, %v1729_v8  ;;  %v1726_v13 = vmul.f32 0.0078125, %v1724_v10 }
 0x964   : > { %3409 = vrsqrt.f32 %v1733_v12  ;;  %v1730_v14 = vsub.f32 %v1726_v13, %v1728_v11 }
 0x966   : > { %v1734_v15 = vadd.f32 1e-12, %v1730_v14 }
 0x968   : > { %3411 = vrsqrt.f32 %v1734_v15 }
 0x96e   : > { %v3410_v17 = vpop.eup %3409 }
 0x96f   : > { %v1737_v18 = vmul.f32 %v3410_v17, %v1731_v33 }
 0x971   : > { %v1745_v20 = vmul.f32 %v2911_v19, %v1737_v18 }
 0x972   : > { %v3412_v23 = vpop.eup %3411 }
 0x973   : > { %v1738_v24 = vmul.f32 %v3412_v23, %v1732_v21  ;;  %v4174_v27 = vadd.f32 %v2912_v25, %v1745_v20 }
 0x975   : > { %v1746_v9 = vmul.f32 %v2911_v19, %v1738_v24 }
 0x977   : > { %v4176_v28 = vadd.f32 %v2912_v25, %v1746_v9 }
 0x979   : > { %v1755_v32 = vpack.c.bf16 %v4176_v28, %v4174_v27 }
 0x97b   : > { %2003 = vmatmul.mubr.bf16.vlgmr.msra.gmra.mrb[28].mxu1 %v1755_v32  ;;  %2046 = vmatmul.mubr.bf16.vlgmr.msra.gmra.mrb[16].mxu0 %v1755_v32 }
 0x97c   : > { %3032 = vmatpush3.bf16.msra.mxu1 %v3363_v30  ;;  %3054 = vmatpush3.bf16.msra.mxu0 %v3364_v54 }
 0x97d   : > { %3033 = vmatprep.subr.bf16.mxu1 %v3365_v31  ;;  %3055 = vmatprep.subr.bf16.mxu0 %v3366_v26 }
 0x980   : > { %3034 = vmatpush3.bf16.msra.mxu1 %v3367_v34  ;;  %3056 = vmatpush3.bf16.msra.mxu0 %v3368_v36 }
 0x981   : > { %3035 = vmatprep.subr.bf16.mxu1 %v3369_v37  ;;  %3057 = vmatprep.subr.bf16.mxu0 %v3370_v38 }
 0x984   : > { %3036 = vmatpush3.bf16.msra.mxu1 %v3371_v39  ;;  %3058 = vmatpush3.bf16.msra.mxu0 %v3372_v40 }
 0x985   : > { %3037 = vmatprep.subr.bf16.mxu1 %v3373_v41  ;;  %3059 = vmatprep.subr.bf16.mxu0 %v3374_v35 }
 0x988   : > { %3038 = vmatpush3.bf16.msra.mxu1 %v3375_v42  ;;  %3060 = vmatpush3.bf16.msra.mxu0 %v3376_v43 }
 0x989   : > { %3039 = vmatprep.subr.bf16.mxu1 %v3377_v44  ;;  %3061 = vmatprep.subr.bf16.mxu0 %v3378_v45 }
 0x98c   : > { %3040 = vmatpush3.bf16.msra.mxu1 %v3379_v46  ;;  %3062 = vmatpush3.bf16.msra.mxu0 %v3380_v47 }
 0x98d   : > { %3041 = vmatprep.subr.bf16.mxu1 %v3381_v48  ;;  %3063 = vmatprep.subr.bf16.mxu0 %v3382_v49 }
 0x990   : > { %3042 = vmatpush3.bf16.msra.mxu1 %v3383_v50  ;;  %3064 = vmatpush3.bf16.msra.mxu0 %v3384_v51 }
 0x991   : > { %3043 = vmatprep.subr.bf16.mxu1 %v3385_v22  ;;  %3065 = vmatprep.subr.bf16.mxu0 %v3386_v52 }
 0x994   : > { %3044 = vmatpush3.bf16.msra.mxu1 %v3387_v55  ;;  %3066 = vmatpush3.bf16.msra.mxu0 %v3388_v56 }
 0x995   : > { %3045 = vmatprep.subr.bf16.mxu1 %v3389_v57  ;;  %3067 = vmatprep.subr.bf16.mxu0 %v3390_v58 }
 0x998   : > { %3046 = vmatpush3.bf16.msra.mxu1 %v3391_v59  ;;  %3068 = vmatpush3.bf16.msra.mxu0 %v3392_v62 }
 0xa4e   : > { %v2004_v6 = vpop.f32.mrb[28].mxu1  ;;  %v2047_v7 = vpop.f32.mrb[16].mxu0 }
 0xa4f   : > { %v4220_v8 = vadd.f32 %v2004_v6, %v1793_v2  ;;  %v4222_v10 = vadd.f32 %v2047_v7, %v1801_v3  ;;  %v2006_v11 = vpop.f32.mrb[29].mxu1  ;;  %v2049_v12 = vpop.f32.mrb[17].mxu0 }
 0xa50   : > { %v4224_v13 = vadd.f32 %v2006_v11, %v1797_v4  ;;  %v4226_v14 = vadd.f32 %v2049_v12, %v1805_v5  ;;  %v2008_v0 = vpop.f32.mrb[30].mxu1  ;;  %v2051_v15 = vpop.f32.mrb[18].mxu0 }
 0xa51   : > { %v2056_v16 = vmul.f32 %v4220_v8, %v4220_v8  ;;  %v2058_v60 = vmul.f32 %v4222_v10, %v4222_v10  ;;  %v4232_v61 = vadd.f32 %v2008_v0, %v1793_v2  ;;  %v4234_v33 = vadd.f32 %v2051_v15, %v1801_v3  ;;  %v2010_v17 = vpop.f32.mrb[31].mxu1  ;;  %v2053_v18 = vpop.f32.mrb[19].mxu0 }
 0xa52   : > { %v2057_v19 = vmul.f32 %v4224_v13, %v4224_v13  ;;  %v2059_v21 = vmul.f32 %v4226_v14, %v4226_v14  ;;  %v4240_v23 = vadd.f32 %v2010_v17, %v1797_v4  ;;  %v4242_v24 = vadd.f32 %v2053_v18, %v1805_v5 }
 0xa53   : > { %v2064_v20 = vmul.f32 %v2056_v16, %v4220_v8  ;;  %v2066_v25 = vmul.f32 %v2058_v60, %v4222_v10  ;;  %v2060_v9 = vmul.f32 %v4232_v61, %v4232_v61  ;;  %v2062_v32 = vmul.f32 %v4234_v33, %v4234_v33 }
 0xa54   : > { %v2065_v53 = vmul.f32 %v2057_v19, %v4224_v13  ;;  %v2067_v29 = vmul.f32 %v2059_v21, %v4226_v14  ;;  %v2061_v30 = vmul.f32 %v4240_v23, %v4240_v23  ;;  %v2063_v54 = vmul.f32 %v4242_v24, %v4242_v24 }
 0xa55   : > { %v2072_v31 = vmul.f32 0.044715, %v2064_v20  ;;  %v2074_v26 = vmul.f32 0.044715, %v2066_v25  ;;  %v2068_v34 = vmul.f32 %v2060_v9, %v4232_v61  ;;  %v2070_v36 = vmul.f32 %v2062_v32, %v4234_v33 }
 0xa56   : > { %v2073_v37 = vmul.f32 0.044715, %v2065_v53  ;;  %v2075_v38 = vmul.f32 0.044715, %v2067_v29  ;;  %v2069_v39 = vmul.f32 %v2061_v30, %v4240_v23  ;;  %v2071_v40 = vmul.f32 %v2063_v54, %v4242_v24 }
 0xa57   : > { %v2080_v41 = vadd.f32 %v2072_v31, %v4220_v8  ;;  %v2082_v35 = vadd.f32 %v2074_v26, %v4222_v10  ;;  %v2076_v42 = vmul.f32 0.044715, %v2068_v34  ;;  %v2078_v43 = vmul.f32 0.044715, %v2070_v36 }
 0xa58   : > { %v2081_v44 = vadd.f32 %v2073_v37, %v4224_v13  ;;  %v2083_v45 = vadd.f32 %v2075_v38, %v4226_v14  ;;  %v2077_v46 = vmul.f32 0.044715, %v2069_v39  ;;  %v2079_v47 = vmul.f32 0.044715, %v2071_v40 }
 0xa59   : > { %v2088_v48 = vmul.f32 0.7978846, %v2080_v41  ;;  %v2090_v49 = vmul.f32 0.7978846, %v2082_v35  ;;  %v2084_v50 = vadd.f32 %v2076_v42, %v4232_v61  ;;  %v2086_v51 = vadd.f32 %v2078_v43, %v4234_v33 }
 0xa5a   : > { %v2089_v22 = vmul.f32 0.7978846, %v2081_v44  ;;  %v2091_v52 = vmul.f32 0.7978846, %v2083_v45  ;;  %v2085_v55 = vadd.f32 %v2077_v46, %v4240_v23  ;;  %v2087_v56 = vadd.f32 %v2079_v47, %v4242_v24 }
 0xa5b   : > { %3413 = vtanh.f32 %v2088_v48  ;;  %v2092_v57 = vmul.f32 0.7978846, %v2084_v50  ;;  %v2094_v58 = vmul.f32 0.7978846, %v2086_v51 }
 0xa5c   : > { %3415 = vtanh.f32 %v2090_v49  ;;  %v2093_v59 = vmul.f32 0.7978846, %v2085_v55  ;;  %v2095_v62 = vmul.f32 0.7978846, %v2087_v56 }
 0xa5d   : > { %3417 = vtanh.f32 %v2089_v22 }
 0xa5e   : > { %3419 = vtanh.f32 %v2091_v52 }
 0xa5f   : > { %3421 = vtanh.f32 %v2092_v57 }
 0xa60   : > { %3423 = vtanh.f32 %v2094_v58 }
 0xa61   : > { %3425 = vtanh.f32 %v2093_v59 }
 0xa62   : > { %3427 = vtanh.f32 %v2095_v62 }
 0xa65   : > { %v3414_v63 = vpop.eup %3413 }
 0xa66   : > { %v3416_v1 = vpop.eup %3415  ;;  %v2104_v2 = vadd.f32 1.0, %v3414_v63 }
 0xa67   : > { %v3418_v3 = vpop.eup %3417  ;;  %v2106_v4 = vadd.f32 1.0, %v3416_v1 }
 0xa68   : > { %v3420_v5 = vpop.eup %3419  ;;  %v2105_v6 = vadd.f32 1.0, %v3418_v3  ;;  %v2112_v0 = vmul.f32 0.5, %v2104_v2 }
 0xa69   : > { %v3422_v7 = vpop.eup %3421  ;;  %v2107_v11 = vadd.f32 1.0, %v3420_v5  ;;  %v2114_v60 = vmul.f32 0.5, %v2106_v4 }
 0xa6a   : > { %v3424_v12 = vpop.eup %3423  ;;  %v2108_v15 = vadd.f32 1.0, %v3422_v7  ;;  %v2113_v20 = vmul.f32 0.5, %v2105_v6  ;;  %v2120_v53 = vmul.f32 %v2112_v0, %v4220_v8 }
 0xa6b   : > { %v3426_v16 = vpop.eup %3425  ;;  %v2110_v17 = vadd.f32 1.0, %v3424_v12  ;;  %v2115_v32 = vmul.f32 0.5, %v2107_v11  ;;  %v2122_v54 = vmul.f32 %v2114_v60, %v4222_v10  ;;  %v2978_v12 = vld [vmem:[%s818_s27] ss:$0 sm:$0xff] }
 0xa6c   : > { %v3428_v18 = vpop.eup %3427  ;;  %v2116_v19 = vmul.f32 0.5, %v2108_v15  ;;  %v2109_v21 = vadd.f32 1.0, %v3426_v16  ;;  %v2121_v34 = vmul.f32 %v2113_v20, %v4224_v13  ;;  %v2945_v13 = vld [vmem:[%s815_s24] ss:$0 sm:$0xff] }
 0xa6d   : > { %v2118_v25 = vmul.f32 0.5, %v2110_v17  ;;  %v2111_v9 = vadd.f32 1.0, %v3428_v18  ;;  %v2123_v38 = vmul.f32 %v2115_v32, %v4226_v14  ;;  %v2979_v60 = vld [vmem:[%s821_s5] ss:$0 sm:$0xff]  ;;  %v3434_v32 = vld [vmem:[%s4435_s29 + $0x8] sm:$0xff] (!%p2980_p7)  }
 0xa6e   : > { %v2124_v29 = vmul.f32 %v2116_v19, %v4232_v61  ;;  %v2117_v30 = vmul.f32 0.5, %v2109_v21 }
 0xa6f   : > { %v2126_v31 = vmul.f32 %v2118_v25, %v4234_v33  ;;  %v2119_v26 = vmul.f32 0.5, %v2111_v9  ;;  %v3433_v25 = vld [vmem:[%s4435_s29] sm:$0xff] (!%p2980_p7)   ;;  %v3616_v9 = vmov (!%p2980_p7), 0.0  }
 0xa70   : > { %v2125_v36 = vmul.f32 %v2117_v30, %v4240_v23  ;;  %v2128_v37 = vpack.c.bf16 %v2124_v29, %v2120_v53  ;;  %3172 = vmatprep.subr.bf16.mxu0 (!%p2980_p7), %v3616_v9  ;;  %v3435_v53 = vld [vmem:[%s4435_s29 + $0x10] sm:$0xff] (!%p2980_p7)   ;;  %v3436_v29 = vld [vmem:[%s4435_s29 + $0x18] sm:$0xff] (!%p2980_p7)   ;;  %v3437_v30 = vld [vmem:[%s4435_s29 + $0x20] sm:$0xff] (!%p2980_p7)  }
 0xa71   : > { %v2127_v39 = vmul.f32 %v2119_v26, %v4242_v24  ;;  %v2130_v40 = vpack.c.bf16 %v2126_v31, %v2122_v54  ;;  %v3438_v31 = vld [vmem:[%s4435_s29 + $0x28] sm:$0xff] (!%p2980_p7)  }
 0xa72   : > { %v2129_v8 = vpack.c.bf16 %v2125_v36, %v2121_v34  ;;  %v3439_v36 = vld [vmem:[%s4435_s29 + $0x30] sm:$0xff] (!%p2980_p7)  }
 0xa73   : > { %v2131_v41 = vpack.c.bf16 %v2127_v39, %v2123_v38  ;;  %v3440_v39 = vld [vmem:[%s4435_s29 + $0x38] sm:$0xff] (!%p2980_p7)  }
 0xa74   : > { %2427 = vmatprep.mubr.bf16.mxu1 %v2129_v8 }
 0xa75   : > { %2468 = vmatprep.mubr.bf16.mxu0 %v2131_v41  ;;  %2428 = vmatmul.mubr.bf16.vlgmr.msra.gmra.mrb[32].mxu1 %v2128_v37  ;;  %v2981_v41 = vld [vmem:[%s4436_s21] ss:$0 sm:$0xff] (!%p2980_p7) }
 0xa76   : > { %2469 = vmatmul.mubr.bf16.vlgmr.msra.gmra.mrb[20].mxu0 %v2130_v40 }
 0xa77   : > { %3173 = vmatpush3.bf16.msra.mxu0 (!%p2980_p7), %v3433_v25  ;;  %3188 = vmatprep.mubr.msk.bf16.mxu0 (!%p2980_p7), %vm3617_vm4, %v3616_v9 }
 0xa78   : > { %3174 = vmatprep.subr.bf16.mxu0 (!%p2980_p7), %v3616_v9 }
 0xa7b   : > { %3175 = vmatpush3.bf16.msra.mxu0 (!%p2980_p7), %v3434_v32 }
 0xa7c   : > { %3176 = vmatprep.subr.bf16.mxu0 (!%p2980_p7), %v3616_v9 }
 0xa7f   : > { %3177 = vmatpush3.bf16.msra.mxu0 (!%p2980_p7), %v3435_v53 }
 0xa80   : > { %3178 = vmatprep.subr.bf16.mxu0 (!%p2980_p7), %v3616_v9 }
 0xa83   : > { %3179 = vmatpush3.bf16.msra.mxu0 (!%p2980_p7), %v3436_v29 }
 0xa84   : > { %3180 = vmatprep.subr.bf16.mxu0 (!%p2980_p7), %v3616_v9 }
 0xa87   : > { %3181 = vmatpush3.bf16.msra.mxu0 (!%p2980_p7), %v3437_v30 }
 0xa88   : > { %3182 = vmatprep.subr.bf16.mxu0 (!%p2980_p7), %v3616_v9 }
 0xa8b   : > { %3183 = vmatpush3.bf16.msra.mxu0 (!%p2980_p7), %v3438_v31 }
 0xa8c   : > { %3184 = vmatprep.subr.bf16.mxu0 (!%p2980_p7), %v3616_v9 }
 0xa8f   : > { %3185 = vmatpush3.bf16.msra.mxu0 (!%p2980_p7), %v3439_v36 }
 0xa90   : > { %3186 = vmatprep.subr.bf16.mxu0 (!%p2980_p7), %v3616_v9 }
 0xa93   : > { %3187 = vmatpush3.bf16.msra.mxu0 (!%p2980_p7), %v3440_v39 }
 0xb48   : > { %v3047_v10 = vpop.f32.mrb[32].mxu1 }
 0xb49   : > { %v3069_v61 = vpop.f32.mrb[20].mxu0  ;;  %v3048_v33 = vpop.f32.mrb[33].mxu1 }
 0xb4a   : > { %v3049_v23 = vadd.f32 %v3048_v33, %v3047_v10  ;;  %v3070_v35 = vpop.f32.mrb[21].mxu0  ;;  %v3050_v14 = vpop.f32.mrb[34].mxu1 }
 0xb4b   : > { %v3071_v42 = vadd.f32 %v3070_v35, %v3069_v61  ;;  %v3072_v24 = vpop.f32.mrb[22].mxu0  ;;  %v3051_v43 = vpop.f32.mrb[35].mxu1 }
 0xb4c   : > { %v2430_v44 = vadd.f32 %v3049_v23, %v2945_v13  ;;  %v3052_v45 = vadd.f32 %v3051_v43, %v3050_v14  ;;  %v3073_v46 = vpop.f32.mrb[23].mxu0 }
 0xb4d   : > { %v3074_v47 = vadd.f32 %v3073_v46, %v3072_v24 }
 0xb4e   : > { %v2471_v48 = vadd.f32 %v3071_v42, %v2430_v44  ;;  %v2433_v49 = vadd.f32 %v3052_v45, %v2945_v13 }
 0xb50   : > { %v2474_v50 = vadd.f32 %v3074_v47, %v2433_v49  ;;  %v2477_v51 = vadd.f32 %v2471_v48, %v4174_v27 }
 0xb52   : > { %2481 = vadd.xlane.f32.xlu1 %v2477_v51  ;;  %v2478_v22 = vadd.f32 %v2474_v50, %v4176_v28  ;;  %v2487_v52 = vmul.f32 %v2477_v51, %v2477_v51 }
 0xb54   : > { %2483 = vadd.xlane.f32.xlu0 %v2478_v22  ;;  %v2488_v55 = vmul.f32 %v2478_v22, %v2478_v22 }
 0xb56   : > { %2489 = vadd.xlane.f32.xlu1 %v2487_v52 }
 0xb58   : > { %2491 = vadd.xlane.f32.xlu0 %v2488_v55 }
 0xbdf   : > { %v2482_v56 = vpop.xlane.xlu1 %2481 }
 0xbe0   : > { %v2485_v57 = vmul.f32 0.0078125, %v2482_v56 }
 0xbe1   : > { %v2484_v58 = vpop.xlane.xlu0 %2483 }
 0xbe2   : > { %v2486_v59 = vmul.f32 0.0078125, %v2484_v58  ;;  %v2495_v63 = vmul.f32 %v2485_v57, %v2485_v57  ;;  %v2499_v7 = vsub.f32 %v2477_v51, %v2485_v57 }
 0xbe3   : > { %v2490_v62 = vpop.xlane.xlu1 %2489 }
 0xbe4   : > { %v2493_v1 = vmul.f32 0.0078125, %v2490_v62  ;;  %v2496_v3 = vmul.f32 %v2486_v59, %v2486_v59  ;;  %v2500_v0 = vsub.f32 %v2478_v22, %v2486_v59 }
 0xbe5   : > { %v2492_v2 = vpop.xlane.xlu0 %2491 }
 0xbe6   : > { %v2497_v27 = vsub.f32 %v2493_v1, %v2495_v63  ;;  %v2494_v4 = vmul.f32 0.0078125, %v2492_v2 }
 0xbe8   : > { %v2501_v5 = vadd.f32 1e-12, %v2497_v27  ;;  %v2498_v28 = vsub.f32 %v2494_v4, %v2496_v3 }
 0xbea   : > { %3429 = vrsqrt.f32 %v2501_v5  ;;  %v2502_v6 = vadd.f32 1e-12, %v2498_v28 }
 0xbec   : > { %3431 = vrsqrt.f32 %v2502_v6 }
 0xbf4   : > { %v3430_v11 = vpop.eup %3429 }
 0xbf5   : > { %v2505_v15 = vmul.f32 %v3430_v11, %v2499_v7 }
 0xbf6   : > { %v3432_v16 = vpop.eup %3431 }
 0xbf7   : > { %v2513_v17 = vmul.f32 %v2978_v12, %v2505_v15  ;;  %v2506_v18 = vmul.f32 %v3432_v16, %v2500_v0  ;;  %2528 = sbr.rel (%p2980_p7) target bundleno = 3304 (0xce8), region = 112 }
 0xbf9   : > { %v2521_v19 = vadd.f32 %v2979_v60, %v2513_v17  ;;  %v2514_v21 = vmul.f32 %v2978_v12, %v2506_v18 }
 0xbfb   : > { %2523 = vst [vmem:[#allocation2] sm:$0xff] %v2521_v19  ;;  %v2522_v20 = vadd.f32 %v2979_v60, %v2514_v21  ;;  %2529 = vst [vmem:[%s4434_s17] sm:$0xff] (!%p2980_p7), %v2521_v19  ;;  %v2531_v26 = vpack.c.bf16 (!%p2980_p7), %v2521_v19, %v2521_v19 }
 0xbfd   : > { %2524 = vst [vmem:[#allocation2 + $0x8] sm:$0xff] %v2522_v20  ;;  %2530 = vst [vmem:[%s4434_s17 + $0x8] sm:$0xff] (!%p2980_p7), %v2522_v20  ;;  %v2532_v54 = vpack.c.bf16 (!%p2980_p7), %v2522_v20, %v2522_v20  ;;  %v2558_v37 = vunpack.c.l.b16 (!%p2980_p7), %v2531_v26 }
 0xbff   : > { %v2559_v34 = vunpack.c.l.b16 %v2532_v54 }
 0xc01   : > { %v2560_v38 = vrot.slane %v2559_v34, 7 }
 0xc03   : > { %v2562_v40 = vsel %vm2561_vm5, %v2560_v38, %v2558_v37 }
 0xc04   : > { %v2563_v8 = vpack.c.b16 %v2562_v40, %v2562_v40 }
 0xc06   : > { %3189 = vmatmul.mubr.bf16.vlgmr.msra.gmra.mrb[0].mxu0 %v2563_v8 }
 0xcd9   : > { %v2647_v10 = vpop.f32.mrb[0].mxu0 }
 0xcda   : > { %v2648_v61 = vadd.f32 %v2981_v41, %v2647_v10  ;;  %v3190_v13 = vpop.f32.mrb[1].mxu0 }
 0xcdb   : > { %v2650_v33 = vpop.f32.mrb[2].mxu0 }
 0xcdc   : > { %3441 = vtanh.f32 %v2648_v61  ;;  %v3191_v23 = vpop.f32.mrb[3].mxu0 }
 0xce6   : > { %v3442_v35 = vpop.eup %3441 }
 0xce7   : > { %2654 = vst [vmem:[#allocation9] sm:$0x3] %v3442_v35 }
 0xce8 PF: > { %p3217_p12 = scmp.eq.s32.totalorder %s3738_s1, 1  ;;  %s3618_s15 = smov [#allocation9]  }
 0xce9   : > { %s2665_s5 = sshll.u32 %s3618_s15, 4  ;;  %s2666_s5 = int_to_ptr.vmem [resolvable:$true] %s2665_s5 }
 0xcea   : > { %s3533_s20 = scalar_lea.vmem %s2666_s5, 32  ;;  %p3540_p6 = scmp.lt.s32.totalorder %s2666_s5, %s2666_s5 }
 0xceb   : > { %p3534_p2 = scmp.ne.s32.totalorder %s2666_s5, %s3533_s20  ;;  %p3541_p4 = scmp.lt.s32.totalorder %s3533_s20, %s3533_s20 }
 0xced   : > { %p3535_p3 = pnand %p3534_p2, %p3217_p12  ;;  %p3542_p1 = por %p3541_p4, %p3540_p6 }
 0xcef   : > { %p3536_p5 = pneg %p3535_p3 }
 0xcf1   : > { %p3543_p11 = pnand %p3542_p1, %p3536_p5 }
 0xcf3   : > { %3546 = shalt.err (!%p3543_p11)
}
 0xcf4   : > { %s4437_s10 = sld [smem:[#allocation29_spill]] }
 0xcfa   : > { %s3547_s23 = scalar_lea.hbm %s4437_s10, 32 }
 0xcfb   : > { %p3548_p13 = scmp.ne.s32.totalorder %s4437_s10, %s3547_s23  ;;  %p3553_p8 = scmp.lt.u32.totalorder %s3547_s23, %s4437_s10 }
 0xcfd   : > { %p3549_p10 = pnand %p3548_p13, %p3217_p12 }
 0xcff   : > { %p3550_p9 = pneg %p3549_p10 }
 0xd01   : > { %p3555_p0 = pnand %p3553_p8, %p3550_p9 }
 0xd03   : > { %3558 = shalt.err (!%p3555_p0)
}
 0xd04   : > { %3203 = dma.vmem_to_hbm [thread:$0]  (%p3217_p12), %s2666_s5, 32, %s4437_s10, [#allocation5]  }
 0xd05   : > { %3584 = dma.done.wait (%p3217_p12), [#allocation5], 32  }
 0xd06   : > { %3586 = vsyncadd (%p3217_p12), [#allocation5], 4294967264 }
 0xd07 PF: > { %s4438_s21 = sld [smem:[#allocation14_spill]]  ;;  %s4439_s28 = sld [smem:[#allocation13_spill]] }
 0xd08   : > { %s4440_s20 = sld [smem:[#allocation15_spill]]  ;;  %s4441_s0 = smov %s3593_s30 }
 0xd0d   : > { %p34_p7 = scmp.ge.s32.totalorder %s4438_s21, 4   ;;  %s4442_s30 = smov %s4439_s28 }
 0xd0f   :  { %36 = sbr.rel (!%p34_p7) target bundleno = 21 (0x15), region = 196 }
 0xd16   :  { %2681 = vsyncpa [#allocation4], 1 }
 0xd17   :  { %2683 = vsyncpa [#allocation4 + $0x1], 1 }
 0xd18   :  { %2684 = vsyncpa [#allocation7], 1 }
 0xd19   :  { %2686 = vsyncpa [#allocation7 + $0x1], 1 }
 0xd1a   :  { %2687 = vsyncpa [#allocation5], 1 }
 0xd1b   :  { %2689 = vsyncpa [#allocation5 + $0x1], 1 }

</bundles_post_ra>
